<compile_context>
chip_gen: v7x
topology: tpu7x:2x2x1
jax: 0.10.0
libtpu: 0.0.40
codegen_flags: <defaults>
</compile_context>

<pallas_src>
import functools

import numpy as np

import jax
import jax.numpy as jnp
from jax import lax
from jax.experimental import pallas as pl
from jax.experimental.pallas import tpu as pltpu


# ----------------------------------------------------------------------------- exp ladder plan
def _build_exp_plan(alphas):
    """Static plan: single exp + repeated squaring when alphas are integer multiples of min."""
    alphas = tuple(float(a) for a in alphas)
    amin = min(alphas)
    if amin > 0.0:
        ratios = [a / amin for a in alphas]
        ints = [int(round(r)) for r in ratios]
        ok = all(i >= 1 and abs(r - i) <= 1e-6 * max(1.0, abs(r))
                 for r, i in zip(ratios, ints))
        if ok and max(ints) <= 4096:
            return ("ladder", amin, tuple(ints))
    return ("generic", alphas)


def _multi_gaussian_mean(sqd, plan):
    """mean_a exp(-alpha_a * sqd).

    'ladder' plan: ONE EUP exp, then repeated squaring with the accumulation fused into the
    power chain — for the module's pure 2^k ladder only `cur` and `acc` (2 big temps) are live.
    """
    if plan[0] == "ladder":
        amin, exps = plan[1], plan[2]
        max_e = max(exps)
        cur = jnp.exp(-amin * sqd)            # cur == e ** bit
        acc = None
        partial = [None] * len(exps)          # per-exponent partial products (None == 1)
        bit = 1
        while True:
            for i, m in enumerate(exps):
                if m & bit:
                    partial[i] = cur if partial[i] is None else partial[i] * cur
                    if m < (bit << 1):        # highest set bit consumed -> fold into acc, drop
                        acc = partial[i] if acc is None else acc + partial[i]
                        partial[i] = None
            if (bit << 1) > max_e:
                break
            cur = cur * cur
            bit <<= 1
        return acc * (1.0 / len(exps))
    # generic fallback: one exp per alpha
    alphas = plan[1]
    acc = jnp.exp(-alphas[0] * sqd)
    for a in alphas[1:]:
        acc = acc + jnp.exp(-a * sqd)
    return acc * (1.0 / len(alphas))


# ----------------------------------------------------------------------------- kernel body
def _mmd_gaussian_kernel(sel_ref, q_ref, s_ref, out_ref, xbuf_ref, *,
                         exp_plan, tem, nq, ns, nqf, nsf, pq_pad, p_pad, gram_dtype):
    # sel_ref:  (G, P_pad)     one-hot group selector, G = NQ + NS; padded-point columns are 0
    # q_ref:    (Bblk, PQ, C)  flattened query points
    # s_ref:    (Bblk, PS, C)  flattened support points
    # xbuf_ref: (Bblk, P_pad, C) VMEM assembly buffer
    bblk, pq, c = q_ref.shape
    ps = s_ref.shape[1]
    g = nq + ns

    # ---- assemble [query ; pad ; support ; pad] into one VMEM buffer (no HBM concat) ----
    xbuf_ref[:, :pq, :] = q_ref[...]
    xbuf_ref[:, pq_pad:pq_pad + ps, :] = s_ref[...]
    if pq_pad > pq:                    # alignment pad between the query and support blocks
        xbuf_ref[:, pq:pq_pad, :] = jnp.zeros((bblk, pq_pad - pq, c), xbuf_ref.dtype)
    if p_pad > pq_pad + ps:            # tail pad up to the 128-multiple point count
        xbuf_ref[:, pq_pad + ps:, :] = jnp.zeros((bblk, p_pad - pq_pad - ps, c),
                                                 xbuf_ref.dtype)

    xm = xbuf_ref[...].astype(gram_dtype)                       # MXU operand
    xf = xm.astype(jnp.float32)                                  # == buffer when gram_dtype=f32

    # ---- one fused gram per episode (single batched MXU matmul) ----
    gram = lax.dot_general(xm, xm, (((2,), (2,)), ((0,), (0,))),
                           preferred_element_type=jnp.float32)   # (Bblk, P_pad, P_pad)
    norms = jnp.sum(xf * xf, axis=-1)                            # (Bblk, P_pad)
    # NOTE: max(.,0) clamps negative round-off the reference's direct (x-y)^2 form cannot make.
    sqd = jnp.maximum(norms[:, :, None] + norms[:, None, :] - 2.0 * gram, 0.0)

    k = _multi_gaussian_mean(sqd, exp_plan)                      # (Bblk, P_pad, P_pad)

    # ---- group reductions on the MXU: t2 = sel @ K @ sel^T ----
    sel = sel_ref[...]                                           # (G, P_pad)
    sel_b = jnp.broadcast_to(sel[None, :, :], (bblk, g, p_pad))  # tiny; needed for batched dot
    t1 = lax.dot_general(sel_b, k, (((2,), (1,)), ((0,), (0,))),
                         preferred_element_type=jnp.float32)     # (Bblk, G, P_pad) lane-dense
    t2 = lax.dot_general(t1, sel_b, (((2,), (2,)), ((0,), (0,))),
                         preferred_element_type=jnp.float32)     # (Bblk, G, G)

    eye_g = (lax.broadcasted_iota(jnp.int32, (g, g), 0)
             == lax.broadcasted_iota(jnp.int32, (g, g), 1)).astype(jnp.float32)
    t_diag = jnp.sum(t2 * eye_g[None, :, :], axis=-1)            # (Bblk, G) group self-sums

    # ---- trace trick: diag(K) == 1 so within-group off-diag sum = group sum - group size ----
    if nqf > 1:
        mmd_q = (t_diag[:, :nq] - float(nqf)) * (1.0 / (nqf * (nqf - 1)))   # (Bblk, NQ)
    else:
        mmd_q = jnp.ones((bblk, nq), jnp.float32)    # module: mean over a 1x1 kernel == 1
    if nsf > 1:
        mmd_s = (t_diag[:, nq:] - float(nsf)) * (1.0 / (nsf * (nsf - 1)))   # (Bblk, NS)
    else:
        mmd_s = jnp.ones((bblk, ns), jnp.float32)
    mmd_sq = t2[:, :nq, nq:] * (1.0 / (nqf * nsf))                           # (Bblk, NQ, NS)

    out = (mmd_q[:, :, None] + mmd_s[:, None, :] - 2.0 * mmd_sq) * tem
    out_ref[...] = out.astype(out_ref.dtype)


# ----------------------------------------------------------------------------- wrapper helpers
def _round_up(x, m):
    return ((x + m - 1) // m) * m


def _num_tensorcores_per_chip():
    """Best-effort per-chip TensorCore count (v7x / v4 / v5p shard 'parallel' grid axes)."""
    try:
        kind = str(jax.devices()[0].device_kind).lower()
    except Exception:
        return 1
    if "lite" in kind or "v5e" in kind or "v6e" in kind:
        return 1
    if "v7" in kind or "v5p" in kind or "v4" in kind or kind.strip().endswith("v5"):
        return 2
    return 1


def _pick_bblk(b, n_tc, cap):
    """Largest divisor of b that is <= cap and still leaves >= n_tc grid steps."""
    best = 1
    min_steps = min(max(n_tc, 1), b)
    for d in range(1, b + 1):
        if b % d == 0 and d <= cap and (b // d) >= min_steps:
            best = d
    return best


# ----------------------------------------------------------------------------- wrapper
def mmd_distance_gaussian(support_xf, query_xf, alphas, tem, *, use_bf16_gram=False):
    """Pallas forward of MMDDistance(kernel='gaussian') with beta=None, gamma=None."""
    # TODO(synk): the 'linear' kernel branch and the beta/gamma-weighted MMD branch of the
    # reference module are not implemented (the default forward uses gaussian, beta=gamma=None).
    b, ns, nsf, c = support_xf.shape
    _, nq, nqf, _ = query_xf.shape
    pq, ps = nq * nqf, ns * nsf
    pq_pad = _round_up(pq, 8)              # 8-aligned sublane offset for the support block
    p_pad = _round_up(pq_pad + ps, 128)    # point axis padded to a full 128-lane tile
    g = nq + ns

    # Free, contiguous reshapes; no HBM concatenation before the kernel.
    q_flat = query_xf.reshape(b, pq, c).astype(jnp.float32)
    s_flat = support_xf.reshape(b, ps, c).astype(jnp.float32)

    # Constant one-hot group selector (G, P_pad); padded-point columns stay zero.
    sel_np = np.zeros((g, p_pad), np.float32)
    sel_np[np.repeat(np.arange(nq), nqf), np.arange(pq)] = 1.0
    sel_np[nq + np.repeat(np.arange(ns), nsf), pq_pad + np.arange(ps)] = 1.0
    sel = jnp.asarray(sel_np)

    n_tc = _num_tensorcores_per_chip()
    # Episodes per grid step: keep ~3 live (Bblk, P_pad, P_pad) f32 temps at a few MiB, and keep
    # >= n_tc grid steps so the "parallel" batch axis actually feeds every TensorCore on v7x.
    bblk = _pick_bblk(b, n_tc=n_tc, cap=16 if n_tc >= 2 else 32)
    nsteps = b // bblk

    plan = _build_exp_plan(alphas)
    gram_dtype = jnp.bfloat16 if use_bf16_gram else jnp.float32

    kernel = functools.partial(
        _mmd_gaussian_kernel, exp_plan=plan, tem=float(tem),
        nq=nq, ns=ns, nqf=nqf, nsf=nsf, pq_pad=pq_pad, p_pad=p_pad, gram_dtype=gram_dtype)

    return pl.pallas_call(
        kernel,
        out_shape=jax.ShapeDtypeStruct((b, nq, ns), jnp.float32),
        grid=(nsteps,),
        in_specs=[
            pl.BlockSpec((g, p_pad), lambda i: (0, 0)),         # constant selector
            pl.BlockSpec((bblk, pq, c), lambda i: (i, 0, 0)),   # query points
            pl.BlockSpec((bblk, ps, c), lambda i: (i, 0, 0)),   # support points
        ],
        out_specs=pl.BlockSpec((bblk, nq, ns), lambda i: (i, 0, 0)),
        scratch_shapes=[pltpu.VMEM((bblk, p_pad, c), jnp.float32)],
        compiler_params=pltpu.CompilerParams(
            dimension_semantics=("parallel",),
            vmem_limit_bytes=32 * 1024 * 1024),
    )(sel, q_flat, s_flat)


# ----------------------------------------------------------------------------- reference
def mmd_reference(sup, qry, alphas, tem):
    """Pure-JAX mirror of the PyTorch module (gaussian kernel, beta=None, gamma=None)."""
    b, ns, nsf, c = sup.shape
    _, nq, nqf, _ = qry.shape

    def sqdist(x, y):
        return jnp.sum((x[..., :, None, :] - y[..., None, :, :]) ** 2, axis=-1)

    d_ss = sqdist(sup, sup)                             # (b, ns, nsf, nsf)
    d_qq = sqdist(qry, qry)                             # (b, nq, nqf, nqf)
    d_qs = sqdist(sup[:, None], qry[:, :, None])        # (b, nq, ns, nsf, nqf)

    def kern(d):
        return sum(jnp.exp(-a * d) for a in alphas) / len(alphas)

    k_ss, k_qq, k_qs = kern(d_ss), kern(d_qq), kern(d_qs)
    tr_ss = jnp.trace(k_ss, axis1=-2, axis2=-1)
    mmd_s = (jnp.sum(k_ss, axis=(-1, -2)) - tr_ss) / (nsf * (nsf - 1))     # (b, ns)
    tr_qq = jnp.trace(k_qq, axis1=-2, axis2=-1)
    mmd_q = (jnp.sum(k_qq, axis=(-1, -2)) - tr_qq) / (nqf * (nqf - 1))     # (b, nq)
    mmd_sq = jnp.sum(k_qs, axis=(-1, -2)) / (nsf * nqf)                    # (b, nq, ns)
    return (mmd_s[:, None, :] + mmd_q[:, :, None] - 2.0 * mmd_sq) * tem


if __name__ == "__main__":
    key = jax.random.PRNGKey(0)
    k1, k2 = jax.random.split(key)

    # Small few-shot-style episode: 5-way support (9 feats/class), 6 query classes, C=32.
    B, NS, NSF, C = 2, 5, 9, 32
    NQ, NQF = 6, 9

    support_xf = 0.5 * jax.random.normal(k1, (B, NS, NSF, C), dtype=jnp.float32)
    query_xf = 0.5 * jax.random.normal(k2, (B, NQ, NQF, C), dtype=jnp.float32)

    # Deterministic "cfg": alphas = base**k for k in range(-3, 2), temperature.
    ALPHA_BASE = 2.0
    alphas = [ALPHA_BASE ** k for k in range(-3, 2)]
    TEM = 0.1

    out = mmd_distance_gaussian(support_xf, query_xf, alphas, TEM)
    out = jax.block_until_ready(out)

    ref = mmd_reference(support_xf, query_xf, alphas, TEM)
    np.testing.assert_allclose(np.asarray(out), np.asarray(ref), rtol=1e-3, atol=5e-5)

    print("KERNEL_OK")
</pallas_src>

<mosaic_0001>
module attributes {stable_mosaic.version = 11 : i64} {
  func.func @_mmd_gaussian_kernel(%arg0: i32, %arg1: memref<11x128xf32, #tpu.memory_space<vmem>>, %arg2: memref<2x54x32xf32, #tpu.memory_space<vmem>>, %arg3: memref<2x45x32xf32, #tpu.memory_space<vmem>>, %arg4: memref<2x6x5xf32, #tpu.memory_space<vmem>>, %arg5: memref<2x128x32xf32, #tpu.memory_space<vmem>>) attributes {dimension_semantics = [#tpu.dimension_semantics<parallel>], iteration_bounds = array<i64: 1>, scalar_prefetch = 0 : i64, scratch_operands = 1 : i64, tpu.core_type = #tpu.core_type<tc>, window_params = [{pipeline_mode = #tpu.pipeline_mode<synchronous>, transform_indices = @transform_0, window_bounds = array<i64: 11, 128>}, {transform_indices = @transform_1, window_bounds = array<i64: 2, 54, 32>}, {transform_indices = @transform_2, window_bounds = array<i64: 2, 45, 32>}, {transform_indices = @transform_3, window_bounds = array<i64: 2, 6, 5>}]} {
    %c0 = arith.constant 0 : index
    %c0_0 = arith.constant 0 : index
    %c0_1 = arith.constant 0 : index
    %0 = vector.load %arg2[%c0, %c0_0, %c0_1] : memref<2x54x32xf32, #tpu.memory_space<vmem>>, vector<2x54x32xf32>
    %c0_2 = arith.constant 0 : index
    %c0_3 = arith.constant 0 : index
    %c0_4 = arith.constant 0 : index
    %1 = vector.load %arg5[%c0_2, %c0_3, %c0_4] : memref<2x128x32xf32, #tpu.memory_space<vmem>>, vector<2x54x32xf32>
    tpu.vector_store %arg5[%c0_2, %c0_3, %c0_4], %0 {strides = array<i32>} : memref<2x128x32xf32, #tpu.memory_space<vmem>>, vector<2x54x32xf32>,
    %c0_5 = arith.constant 0 : index
    %c0_6 = arith.constant 0 : index
    %c0_7 = arith.constant 0 : index
    %2 = vector.load %arg3[%c0_5, %c0_6, %c0_7] : memref<2x45x32xf32, #tpu.memory_space<vmem>>, vector<2x45x32xf32>
    %c0_8 = arith.constant 0 : index
    %c56 = arith.constant 56 : index
    %c0_9 = arith.constant 0 : index
    %3 = vector.load %arg5[%c0_8, %c56, %c0_9] : memref<2x128x32xf32, #tpu.memory_space<vmem>>, vector<2x45x32xf32>
    tpu.vector_store %arg5[%c0_8, %c56, %c0_9], %2 {strides = array<i32>} : memref<2x128x32xf32, #tpu.memory_space<vmem>>, vector<2x45x32xf32>,
    %cst = arith.constant 0.000000e+00 : f32
    %4 = vector.broadcast %cst : f32 to vector<2x2x32xf32>
    %c0_10 = arith.constant 0 : index
    %c54 = arith.constant 54 : index
    %c0_11 = arith.constant 0 : index
    %5 = vector.load %arg5[%c0_10, %c54, %c0_11] : memref<2x128x32xf32, #tpu.memory_space<vmem>>, vector<2x2x32xf32>
    tpu.vector_store %arg5[%c0_10, %c54, %c0_11], %4 {strides = array<i32>} : memref<2x128x32xf32, #tpu.memory_space<vmem>>, vector<2x2x32xf32>,
    %cst_12 = arith.constant 0.000000e+00 : f32
    %6 = vector.broadcast %cst_12 : f32 to vector<2x27x32xf32>
    %c0_13 = arith.constant 0 : index
    %c101 = arith.constant 101 : index
    %c0_14 = arith.constant 0 : index
    %7 = vector.load %arg5[%c0_13, %c101, %c0_14] : memref<2x128x32xf32, #tpu.memory_space<vmem>>, vector<2x27x32xf32>
    tpu.vector_store %arg5[%c0_13, %c101, %c0_14], %6 {strides = array<i32>} : memref<2x128x32xf32, #tpu.memory_space<vmem>>, vector<2x27x32xf32>,
    %c0_15 = arith.constant 0 : index
    %c0_16 = arith.constant 0 : index
    %c0_17 = arith.constant 0 : index
    %8 = vector.load %arg5[%c0_15, %c0_16, %c0_17] : memref<2x128x32xf32, #tpu.memory_space<vmem>>, vector<2x128x32xf32>
    %cst_18 = arith.constant dense<0.000000e+00> : vector<2x128x128xf32>
    %9 = tpu.matmul %8, %8, %cst_18 {dimension_numbers = #tpu.dot_dimension_numbers<[2], [2], [1], [1], [0, 0, 0, 1, 1, 1], [0], [0]>} : vector<2x128x32xf32>, vector<2x128x32xf32>, vector<2x128x128xf32> -> vector<2x128x128xf32>
    %10 = arith.mulf %8, %8 : vector<2x128x32xf32>
    %cst_19 = arith.constant dense<0.000000e+00> : vector<2x128xf32>
    %11 = vector.multi_reduction <add>, %10, %cst_19 [2] : vector<2x128x32xf32> to vector<2x128xf32>
    %12 = vector.shape_cast %11 : vector<2x128xf32> to vector<2x128x1xf32>
    %13 = vector.shape_cast %11 : vector<2x128xf32> to vector<2x1x128xf32>
    %14 = vector.broadcast %12 : vector<2x128x1xf32> to vector<2x128x128xf32>
    %15 = vector.broadcast %13 : vector<2x1x128xf32> to vector<2x128x128xf32>
    %16 = arith.addf %14, %15 : vector<2x128x128xf32>
    %cst_20 = arith.constant 2.000000e+00 : f32
    %17 = vector.broadcast %cst_20 : f32 to vector<2x128x128xf32>
    %18 = arith.mulf %17, %9 : vector<2x128x128xf32>
    %19 = arith.subf %16, %18 : vector<2x128x128xf32>
    %cst_21 = arith.constant 0.000000e+00 : f32
    %20 = vector.broadcast %cst_21 : f32 to vector<2x128x128xf32>
    %21 = arith.maximumf %19, %20 : vector<2x128x128xf32>
    %cst_22 = arith.constant -1.250000e-01 : f32
    %22 = vector.broadcast %cst_22 : f32 to vector<2x128x128xf32>
    %23 = arith.mulf %22, %21 : vector<2x128x128xf32>
    %24 = math.exp %23 : vector<2x128x128xf32>
    %25 = arith.mulf %24, %24 : vector<2x128x128xf32>
    %26 = arith.addf %24, %25 : vector<2x128x128xf32>
    %27 = arith.mulf %25, %25 : vector<2x128x128xf32>
    %28 = arith.addf %26, %27 : vector<2x128x128xf32>
    %29 = arith.mulf %27, %27 : vector<2x128x128xf32>
    %30 = arith.addf %28, %29 : vector<2x128x128xf32>
    %31 = arith.mulf %29, %29 : vector<2x128x128xf32>
    %32 = arith.addf %30, %31 : vector<2x128x128xf32>
    %cst_23 = arith.constant 2.000000e-01 : f32
    %33 = vector.broadcast %cst_23 : f32 to vector<2x128x128xf32>
    %34 = arith.mulf %32, %33 : vector<2x128x128xf32>
    %c0_24 = arith.constant 0 : index
    %c0_25 = arith.constant 0 : index
    %35 = vector.load %arg1[%c0_24, %c0_25] : memref<11x128xf32, #tpu.memory_space<vmem>>, vector<11x128xf32>
    %36 = vector.shape_cast %35 : vector<11x128xf32> to vector<1x11x128xf32>
    %37 = vector.shape_cast %36 : vector<1x11x128xf32> to vector<1x11x128xf32>
    %38 = vector.broadcast %37 : vector<1x11x128xf32> to vector<2x11x128xf32>
    %cst_26 = arith.constant dense<0.000000e+00> : vector<2x11x128xf32>
    %39 = tpu.matmul %38, %34, %cst_26 {dimension_numbers = #tpu.dot_dimension_numbers<[2], [1], [1], [2], [0, 0, 0, 1, 1, 2], [0], [0]>} : vector<2x11x128xf32>, vector<2x128x128xf32>, vector<2x11x128xf32> -> vector<2x11x128xf32>
    %cst_27 = arith.constant dense<0.000000e+00> : vector<2x11x11xf32>
    %40 = tpu.matmul %39, %38, %cst_27 {dimension_numbers = #tpu.dot_dimension_numbers<[2], [2], [1], [1], [0, 0, 0, 1, 1, 1], [0], [0]>} : vector<2x11x128xf32>, vector<2x11x128xf32>, vector<2x11x11xf32> -> vector<2x11x11xf32>
    %41 = tpu.iota {dimensions = array<i32: 0>} : vector<11x11xi32>
    %42 = tpu.iota {dimensions = array<i32: 1>} : vector<11x11xi32>
    %43 = arith.cmpi eq, %41, %42 : vector<11x11xi32>
    %44 = arith.extui %43 : vector<11x11xi1> to vector<11x11xi32>
    %45 = arith.sitofp %44 : vector<11x11xi32> to vector<11x11xf32>
    %46 = vector.shape_cast %45 : vector<11x11xf32> to vector<1x11x11xf32>
    %47 = vector.broadcast %46 : vector<1x11x11xf32> to vector<2x11x11xf32>
    %48 = arith.mulf %40, %47 : vector<2x11x11xf32>
    %cst_28 = arith.constant dense<0.000000e+00> : vector<2x11xf32>
    %49 = vector.multi_reduction <add>, %48, %cst_28 [2] : vector<2x11x11xf32> to vector<2x11xf32>
    %50 = vector.extract_strided_slice %49 {offsets = [0, 0], sizes = [2, 6], strides = [1, 1]} : vector<2x11xf32> to vector<2x6xf32>
    %cst_29 = arith.constant 9.000000e+00 : f32
    %51 = vector.broadcast %cst_29 : f32 to vector<2x6xf32>
    %52 = arith.subf %50, %51 : vector<2x6xf32>
    %cst_30 = arith.constant 0.013888889 : f32
    %53 = vector.broadcast %cst_30 : f32 to vector<2x6xf32>
    %54 = arith.mulf %52, %53 : vector<2x6xf32>
    %55 = vector.extract_strided_slice %49 {offsets = [0, 6], sizes = [2, 5], strides = [1, 1]} : vector<2x11xf32> to vector<2x5xf32>
    %cst_31 = arith.constant 9.000000e+00 : f32
    %56 = vector.broadcast %cst_31 : f32 to vector<2x5xf32>
    %57 = arith.subf %55, %56 : vector<2x5xf32>
    %cst_32 = arith.constant 0.013888889 : f32
    %58 = vector.broadcast %cst_32 : f32 to vector<2x5xf32>
    %59 = arith.mulf %57, %58 : vector<2x5xf32>
    %60 = vector.extract_strided_slice %40 {offsets = [0, 0, 6], sizes = [2, 6, 5], strides = [1, 1, 1]} : vector<2x11x11xf32> to vector<2x6x5xf32>
    %cst_33 = arith.constant 0.0123456791 : f32
    %61 = vector.broadcast %cst_33 : f32 to vector<2x6x5xf32>
    %62 = arith.mulf %60, %61 : vector<2x6x5xf32>
    %63 = vector.shape_cast %54 : vector<2x6xf32> to vector<2x6x1xf32>
    %64 = vector.shape_cast %59 : vector<2x5xf32> to vector<2x1x5xf32>
    %65 = vector.broadcast %63 : vector<2x6x1xf32> to vector<2x6x5xf32>
    %66 = vector.broadcast %64 : vector<2x1x5xf32> to vector<2x6x5xf32>
    %67 = arith.addf %65, %66 : vector<2x6x5xf32>
    %cst_34 = arith.constant 2.000000e+00 : f32
    %68 = vector.broadcast %cst_34 : f32 to vector<2x6x5xf32>
    %69 = arith.mulf %68, %62 : vector<2x6x5xf32>
    %70 = arith.subf %67, %69 : vector<2x6x5xf32>
    %cst_35 = arith.constant 1.000000e-01 : f32
    %71 = vector.broadcast %cst_35 : f32 to vector<2x6x5xf32>
    %72 = arith.mulf %70, %71 : vector<2x6x5xf32>
    %c0_36 = arith.constant 0 : index
    %c0_37 = arith.constant 0 : index
    %c0_38 = arith.constant 0 : index
    %73 = vector.load %arg4[%c0_36, %c0_37, %c0_38] : memref<2x6x5xf32, #tpu.memory_space<vmem>>, vector<2x6x5xf32>
    tpu.vector_store %arg4[%c0_36, %c0_37, %c0_38], %72 {strides = array<i32>} : memref<2x6x5xf32, #tpu.memory_space<vmem>>, vector<2x6x5xf32>,
    return
  }
  func.func @transform_0(%arg0: i32) -> (i32, i32) {
    %c0_i32 = arith.constant 0 : i32
    %c0_i32_0 = arith.constant 0 : i32
    %c0_i32_1 = arith.constant 0 : i32
    return %c0_i32, %c0_i32_0 : i32, i32
  }
  func.func @transform_1(%arg0: i32) -> (i32, i32, i32) {
    %c0_i32 = arith.constant 0 : i32
    %c0_i32_0 = arith.constant 0 : i32
    %c0_i32_1 = arith.constant 0 : i32
    return %arg0, %c0_i32, %c0_i32_0 : i32, i32, i32
  }
  func.func @transform_2(%arg0: i32) -> (i32, i32, i32) {
    %c0_i32 = arith.constant 0 : i32
    %c0_i32_0 = arith.constant 0 : i32
    %c0_i32_1 = arith.constant 0 : i32
    return %arg0, %c0_i32, %c0_i32_0 : i32, i32, i32
  }
  func.func @transform_3(%arg0: i32) -> (i32, i32, i32) {
    %c0_i32 = arith.constant 0 : i32
    %c0_i32_0 = arith.constant 0 : i32
    %c0_i32_1 = arith.constant 0 : i32
    return %arg0, %c0_i32, %c0_i32_0 : i32, i32, i32
  }
}

</mosaic_0001>

<bundles_post_ra>
// kernel: tpu_custom_call.1
= control target key start
LH: loop header
LB: loop body
LE: loop exit
PB: predicated region body
PF: predicated region fallthrough
CT: control target
= control target key end

     0   :  { %vm28_vm0 = vcmask 261120   ;;  %vm69_vm1 = vcmask 254976   ;;  %v2387_v3 = vmov 0.0   ;;  %vm75_vm3 = vcmask 256000   ;;  %s3269_s1 = inlined_call_operand.vmem [shape: f32[2,54,32], index: 1, kind: input, shape index: {}]   ;;  %s3270_s2 = inlined_call_operand.vmem [shape: f32[2,45,32], index: 2, kind: input, shape index: {}]   ;;  %s3271_s0 = inlined_call_operand.vmem [shape: f32[11,128], index: 0, kind: input, shape index: {}]   ;;  %s3272_s3 = inlined_call_operand.vmem [shape: f32[2,6,5], index: 3, kind: output, shape index: {}]  }
   0x1   :  { %v14_v0 = vld [vmem:[%s3269_s1] sm:$0xff]  ;;  %v15_v1 = vld [vmem:[%s3269_s1 + $0x8] sm:$0xff]  ;;  %vm2417_vm2 = vmpackc.low %vm28_vm0, %vm28_vm0  ;;  %70 = vst.msk [vmem:[#allocation2 + $0x36] sm:$0x3] %vm69_vm1, %v2387_v3  ;;  %vm35_vm4 = vcmask 259072   ;;  %vm61_vm5 = vcmask 258048  }
   0x2   :  { %71 = vst.msk [vmem:[#allocation2 + $0xb6] sm:$0x3] %vm69_vm1, %v2387_v3  ;;  %v21_v4 = vld [vmem:[%s3269_s1 + $0x38] sm:$0xff]  ;;  %v22_v5 = vld [vmem:[%s3269_s1 + $0x40] sm:$0xff]  ;;  %v16_v6 = vld [vmem:[%s3269_s1 + $0x10] sm:$0xff]  ;;  %vm670_vm6 = vcmask 130112  }
   0x3   :  { %72 = vst.msk [vmem:[#allocation2 + $0x65] sm:$0xff] %vm28_vm0, %v2387_v3  ;;  %73 = vst.msk [vmem:[#allocation2 + $0x6d] sm:$0xff] %vm28_vm0, %v2387_v3  ;;  %v17_v7 = vld [vmem:[%s3269_s1 + $0x18] sm:$0xff]  ;;  %v23_v8 = vld [vmem:[%s3269_s1 + $0x48] sm:$0xff]  ;;  %vm677_vm7 = vcmask 195712   ;;  %vm684_vm8 = vcmask 261312  }
   0x4   :  { %74 = vst.msk [vmem:[#allocation2 + $0x75] sm:$0xff] %vm28_vm0, %v2387_v3  ;;  %77 = vst.msk [vmem:[#allocation2 + $0xe5] sm:$0xff] %vm28_vm0, %v2387_v3  ;;  %v24_v9 = vld [vmem:[%s3269_s1 + $0x50] sm:$0xff]  ;;  %v18_v10 = vld [vmem:[%s3269_s1 + $0x20] sm:$0xff]  ;;  %vm691_vm9 = vcmask 326912   ;;  %vm698_vm10 = vcmask 392512  }
   0x5   :  { %78 = vst.msk [vmem:[#allocation2 + $0xed] sm:$0xff] %vm28_vm0, %v2387_v3  ;;  %79 = vst.msk [vmem:[#allocation2 + $0xf5] sm:$0xff] %vm28_vm0, %v2387_v3  ;;  %v19_v11 = vld [vmem:[%s3269_s1 + $0x28] sm:$0xff]  ;;  %v25_v12 = vld [vmem:[%s3269_s1 + $0x58] sm:$0xff]  ;;  %vm705_vm11 = vcmask 458112   ;;  %vm712_vm12 = vcmask 523712  }
   0x6   :  { %29 = vst.msk [vmem:[#allocation2] sm:$0xff] %vm28_vm0, %v14_v0  ;;  %30 = vst.msk [vmem:[#allocation2 + $0x8] sm:$0xff] %vm28_vm0, %v15_v1  ;;  %v26_v13 = vld [vmem:[%s3269_s1 + $0x60] sm:$0xff]  ;;  %v20_v14 = vld [vmem:[%s3269_s1 + $0x30] sm:$0x3f]  ;;  %vm719_vm13 = vcmask 589312  }
   0x7   :  { %76 = vst.msk [vmem:[#allocation2 + $0x7d] sm:$0x7] %vm75_vm3, %v2387_v3  ;;  %80 = vst.msk [vmem:[#allocation2 + $0xfd] sm:$0x7] %vm75_vm3, %v2387_v3  ;;  %v44_v15 = vld [vmem:[%s3270_s2] sm:$0xff]  ;;  %v50_v17 = vld [vmem:[%s3270_s2 + $0x30] sm:$0xff] }
   0x8   :  { %37 = vst.msk [vmem:[#allocation2 + $0x80] sm:$0xff] %vm28_vm0, %v21_v4  ;;  %38 = vst.msk [vmem:[#allocation2 + $0x88] sm:$0xff] %vm28_vm0, %v22_v5  ;;  %v27_v16 = vld [vmem:[%s3269_s1 + $0x68] sm:$0x3f]  ;;  %v46_v19 = vld [vmem:[%s3270_s2 + $0x10] sm:$0xff]  ;;  %vm726_vm14 = vcmask 654912  }
   0x9   :  { %31 = vst.msk [vmem:[#allocation2 + $0x10] sm:$0xff] %vm28_vm0, %v16_v6  ;;  %32 = vst.msk [vmem:[#allocation2 + $0x18] sm:$0xff] %vm28_vm0, %v17_v7  ;;  %v45_v18 = vld [vmem:[%s3270_s2 + $0x8] sm:$0xff]  ;;  %v51_v20 = vld [vmem:[%s3270_s2 + $0x38] sm:$0xff]  ;;  %vm733_vm15 = vcmask 720512   ;;  %vm747_vm1 = vcmask 851712  }
   0xa   :  { %39 = vst.msk [vmem:[#allocation2 + $0x90] sm:$0xff] %vm28_vm0, %v23_v8  ;;  %40 = vst.msk [vmem:[#allocation2 + $0x98] sm:$0xff] %vm28_vm0, %v24_v9  ;;  %v52_v21 = vld [vmem:[%s3270_s2 + $0x40] sm:$0xff]  ;;  %v47_v22 = vld [vmem:[%s3270_s2 + $0x18] sm:$0xff]  ;;  %vm761_vm3 = vcmask 982912  }
   0xb   :  { %33 = vst.msk [vmem:[#allocation2 + $0x20] sm:$0xff] %vm28_vm0, %v18_v10  ;;  %34 = vst.msk [vmem:[#allocation2 + $0x28] sm:$0xff] %vm28_vm0, %v19_v11  ;;  %v48_v23 = vld [vmem:[%s3270_s2 + $0x20] sm:$0xff]  ;;  %v53_v24 = vld [vmem:[%s3270_s2 + $0x48] sm:$0xff] }
   0xc   :  { %41 = vst.msk [vmem:[#allocation2 + $0xa0] sm:$0xff] %vm28_vm0, %v25_v12  ;;  %42 = vst.msk [vmem:[#allocation2 + $0xa8] sm:$0xff] %vm28_vm0, %v26_v13  ;;  %v54_v27 = vld [vmem:[%s3270_s2 + $0x50] sm:$0xff]  ;;  %v49_v52 = vld [vmem:[%s3270_s2 + $0x28] sm:$0x1f] }
   0xd   :  { %36 = vst.msk [vmem:[#allocation2 + $0x30] sm:$0x3f] %vm35_vm4, %v20_v14  ;;  %43 = vst.msk [vmem:[#allocation2 + $0xb0] sm:$0x3f] %vm35_vm4, %v27_v16  ;;  %v81_v25 = vld [vmem:[#allocation2] sm:$0xff]  ;;  %v2520_v26 = vld [vmem:[#allocation2 + $0x8] sm:$0xff] }
   0xe   :  { %56 = vst.msk [vmem:[#allocation2 + $0x38] sm:$0xff] %vm28_vm0, %v44_v15  ;;  %63 = vst.msk [vmem:[#allocation2 + $0xb8] sm:$0xff] %vm28_vm0, %v50_v17  ;;  %v2152_v28 = vpack.c.bf16 %v2520_v26, %v81_v25  ;;  %v499_v32 = vmul.f32 %v81_v25, %v81_v25  ;;  %1988 = vmatprep.mubr.msk.f32.mxu0 %vm28_vm0, %v81_v25  ;;  %v500_v41 = vmul.f32 %v2520_v26, %v2520_v26  ;;  %v55_v54 = vld [vmem:[%s3270_s2 + $0x58] sm:$0x1f]  ;;  %vm768_vm4 = vcmask 1048512  }
   0xf   :  { %57 = vst.msk [vmem:[#allocation2 + $0x40] sm:$0xff] %vm28_vm0, %v45_v18  ;;  %58 = vst.msk [vmem:[#allocation2 + $0x48] sm:$0xff] %vm28_vm0, %v46_v19  ;;  %v97_v29 = vld [vmem:[#allocation2 + $0x80] sm:$0xff]  ;;  %v2529_v30 = vld [vmem:[#allocation2 + $0x88] sm:$0xff] }
  0x10   :  { %64 = vst.msk [vmem:[#allocation2 + $0xc0] sm:$0xff] %vm28_vm0, %v51_v20  ;;  %65 = vst.msk [vmem:[#allocation2 + $0xc8] sm:$0xff] %vm28_vm0, %v52_v21  ;;  %v2531_v31 = vld [vmem:[#allocation2 + $0x10] sm:$0xff]  ;;  %v2200_v33 = vpack.c.bf16 %v2529_v30, %v97_v29  ;;  %v2536_v34 = vld [vmem:[#allocation2 + $0x18] sm:$0xff]  ;;  %v515_v37 = vmul.f32 %v97_v29, %v97_v29  ;;  %2044 = vmatprep.mubr.msk.f32.mxu1 %vm28_vm0, %v97_v29  ;;  %2154 = vmatprep.subr.msk.bf16.mxu0 %vm2417_vm2, %v2152_v28  ;;  %v531_v40 = vsel %vm28_vm0, %v499_v32, 0.0 }
  0x11   :  { %59 = vst.msk [vmem:[#allocation2 + $0x50] sm:$0xff] %vm28_vm0, %v47_v22  ;;  %60 = vst.msk [vmem:[#allocation2 + $0x58] sm:$0xff] %vm28_vm0, %v48_v23  ;;  %v2538_v35 = vld [vmem:[#allocation2 + $0x90] sm:$0xff]  ;;  %v2540_v36 = vld [vmem:[#allocation2 + $0x98] sm:$0xff]  ;;  %v2158_v38 = vpack.c.bf16 %v2536_v34, %v2531_v31  ;;  %2157 = vmatpush3.bf16.xpose.msk.msra.mxu0 %vm2417_vm2, %v2152_v28  ;;  %v516_v43 = vmul.f32 %v2529_v30, %v2529_v30  ;;  %532 = vadd.xlane.f32.xlu0 %v531_v40  ;;  %v534_v46 = vsel %vm28_vm0, %v500_v41, 0.0 }
  0x12   :  { %66 = vst.msk [vmem:[#allocation2 + $0xd0] sm:$0xff] %vm28_vm0, %v53_v24  ;;  %67 = vst.msk [vmem:[#allocation2 + $0xd8] sm:$0xff] %vm28_vm0, %v54_v27  ;;  %v2206_v39 = vpack.c.bf16 %v2540_v36, %v2538_v35  ;;  %2202 = vmatprep.subr.msk.bf16.mxu1 %vm2417_vm2, %v2200_v33  ;;  %v579_v42 = vsel %vm28_vm0, %v515_v37, 0.0  ;;  %v2565_v44 = vld [vmem:[#allocation2 + $0x20] sm:$0xff]  ;;  %v2567_v45 = vld [vmem:[#allocation2 + $0x28] sm:$0xff]  ;;  %v501_v49 = vmul.f32 %v2531_v31, %v2531_v31 }
  0x13   :  { %2205 = vmatpush3.bf16.xpose.msk.msra.mxu1 %vm2417_vm2, %v2200_v33  ;;  %2160 = vmatprep.subr.msk.bf16.mxu0 %vm2417_vm2, %v2158_v38  ;;  %v2570_v47 = vld [vmem:[#allocation2 + $0xa0] sm:$0xff]  ;;  %v2572_v48 = vld [vmem:[#allocation2 + $0xa8] sm:$0xff]  ;;  %v582_v50 = vsel %vm28_vm0, %v516_v43, 0.0  ;;  %v517_v51 = vmul.f32 %v2538_v35, %v2538_v35  ;;  %v2164_v53 = vpack.c.bf16 %v2567_v45, %v2565_v44  ;;  %62 = vst.msk [vmem:[#allocation2 + $0x60] sm:$0x1f] %vm61_vm5, %v49_v52 }
  0x14   :  { %2208 = vmatprep.subr.msk.bf16.mxu1 %vm2417_vm2, %v2206_v39  ;;  %580 = vadd.xlane.f32.xlu1 %v579_v42  ;;  %v2212_v55 = vpack.c.bf16 %v2572_v48, %v2570_v47  ;;  %68 = vst.msk [vmem:[#allocation2 + $0xe0] sm:$0x1f] %vm61_vm5, %v55_v54  ;;  %v537_v56 = vsel %vm28_vm0, %v501_v49, 0.0  ;;  %v502_v57 = vmul.f32 %v2536_v34, %v2536_v34  ;;  %v2603_v60 = vld [vmem:[#allocation2 + $0x30] sm:$0xff]  ;;  %v2706_v54 = vld [vmem:[#allocation2 + $0xe8] sm:$0xff] }
  0x15   :  { %535 = vadd.xlane.f32.xlu0 %v534_v46  ;;  %v585_v58 = vsel %vm28_vm0, %v517_v51, 0.0  ;;  %v518_v59 = vmul.f32 %v2540_v36, %v2540_v36  ;;  %v2605_v61 = vld [vmem:[#allocation2 + $0x38] sm:$0xff]  ;;  %v2608_v63 = vld [vmem:[#allocation2 + $0xb0] sm:$0xff]  ;;  %v503_v1 = vmul.f32 %v2565_v44, %v2565_v44  ;;  %v519_v5 = vmul.f32 %v2570_v47, %v2570_v47  ;;  %v2701_v51 = vld [vmem:[#allocation2 + $0x68] sm:$0xff] }
  0x16   :  { %v540_v62 = vsel %vm28_vm0, %v502_v57, 0.0  ;;  %v2610_v0 = vld [vmem:[#allocation2 + $0xb8] sm:$0xff]  ;;  %v2170_v6 = vpack.c.bf16 %v2605_v61, %v2603_v60  ;;  %v504_v9 = vmul.f32 %v2567_v45, %v2567_v45  ;;  %v520_v11 = vmul.f32 %v2572_v48, %v2572_v48  ;;  %v2635_v12 = vld [vmem:[#allocation2 + $0x40] sm:$0xff]  ;;  %v2637_v13 = vld [vmem:[#allocation2 + $0x48] sm:$0xff] }
  0x17   :  { %v588_v4 = vsel %vm28_vm0, %v518_v59, 0.0  ;;  %v2218_v7 = vpack.c.bf16 %v2610_v0, %v2608_v63  ;;  %v543_v8 = vsel %vm28_vm0, %v503_v1, 0.0  ;;  %v591_v10 = vsel %vm28_vm0, %v519_v5, 0.0  ;;  %v2640_v15 = vld [vmem:[#allocation2 + $0xc0] sm:$0xff]  ;;  %v2642_v16 = vld [vmem:[#allocation2 + $0xc8] sm:$0xff] }
  0x18   :  { %583 = vadd.xlane.f32.xlu1 %v582_v50  ;;  %v546_v14 = vsel %vm28_vm0, %v504_v9, 0.0  ;;  %v505_v17 = vmul.f32 %v2603_v60, %v2603_v60  ;;  %v594_v18 = vsel %vm28_vm0, %v520_v11, 0.0  ;;  %v521_v19 = vmul.f32 %v2608_v63, %v2608_v63  ;;  %v2667_v27 = vld [vmem:[#allocation2 + $0x50] sm:$0xff]  ;;  %v2669_v28 = vld [vmem:[#allocation2 + $0x58] sm:$0xff] }
  0x19   :  { %2163 = vmatpush3.bf16.xpose.msk.msra.mxu0 %vm2417_vm2, %v2158_v38  ;;  %538 = vadd.xlane.f32.xlu0 %v537_v56  ;;  %v2176_v20 = vpack.c.bf16 %v2637_v13, %v2635_v12  ;;  %v2224_v21 = vpack.c.bf16 %v2642_v16, %v2640_v15  ;;  %v506_v23 = vmul.f32 %v2605_v61, %v2605_v61  ;;  %v2672_v32 = vld [vmem:[#allocation2 + $0xd0] sm:$0xff]  ;;  %v2674_v33 = vld [vmem:[#allocation2 + $0xd8] sm:$0xff] }
  0x1a   :  { %2166 = vmatprep.subr.msk.bf16.mxu0 %vm2417_vm2, %v2164_v53  ;;  %v549_v22 = vsel %vm28_vm0, %v505_v17, 0.0  ;;  %v597_v24 = vsel %vm28_vm0, %v521_v19, 0.0  ;;  %v522_v25 = vmul.f32 %v2610_v0, %v2610_v0  ;;  %v507_v37 = vmul.f32 %v2635_v12, %v2635_v12  ;;  %v2699_v50 = vld [vmem:[#allocation2 + $0x60] sm:$0xff]  ;;  %v2736_v9 = vld [vmem:[#allocation2 + $0xf0] sm:$0xff] }
  0x1b   :  { %2211 = vmatpush3.bf16.xpose.msk.msra.mxu1 %vm2417_vm2, %v2206_v39  ;;  %v552_v29 = vsel %vm28_vm0, %v506_v23, 0.0  ;;  %v523_v39 = vmul.f32 %v2640_v15, %v2640_v15  ;;  %v2182_v40 = vpack.c.bf16 %v2669_v28, %v2667_v27  ;;  %v2230_v41 = vpack.c.bf16 %v2674_v33, %v2672_v32 }
  0x1c   :  { %2214 = vmatprep.subr.msk.bf16.mxu1 %vm2417_vm2, %v2212_v55  ;;  %586 = vadd.xlane.f32.xlu1 %v585_v58  ;;  %v600_v38 = vsel %vm28_vm0, %v522_v25, 0.0  ;;  %v555_v42 = vsel %vm28_vm0, %v507_v37, 0.0  ;;  %v508_v43 = vmul.f32 %v2637_v13, %v2637_v13  ;;  %v524_v49 = vmul.f32 %v2642_v16, %v2642_v16 }
  0x1d   :  { %541 = vadd.xlane.f32.xlu0 %v540_v62  ;;  %v603_v46 = vsel %vm28_vm0, %v523_v39, 0.0  ;;  %v525_v57 = vmul.f32 %v2672_v32, %v2672_v32  ;;  %v2188_v58 = vpack.c.bf16 %v2701_v51, %v2699_v50  ;;  %v510_v1 = vmul.f32 %v2669_v28, %v2669_v28 }
  0x1e   :  { %v558_v52 = vsel %vm28_vm0, %v508_v43, 0.0  ;;  %v606_v56 = vsel %vm28_vm0, %v524_v49, 0.0  ;;  %v526_v5 = vmul.f32 %v2674_v33, %v2674_v33  ;;  %v511_v11 = vmul.f32 %v2699_v50, %v2699_v50 }
  0x1f   :  { %v528_v23 = vmul.f32 %v2706_v54, %v2706_v54  ;;  %v529_v37 = vmul.f32 %v2736_v9, %v2736_v9 }
  0x20   :  { %589 = vadd.xlane.f32.xlu1 %v588_v4  ;;  %v609_v4 = vsel %vm28_vm0, %v525_v57, 0.0 }
  0x21   :  { %2169 = vmatpush3.bf16.xpose.msk.msra.mxu0 %vm2417_vm2, %v2164_v53  ;;  %544 = vadd.xlane.f32.xlu0 %v543_v8  ;;  %v2704_v53 = vld [vmem:[#allocation2 + $0xe0] sm:$0xff]  ;;  %v564_v8 = vsel %vm28_vm0, %v510_v1, 0.0 }
  0x22   :  { %2172 = vmatprep.subr.msk.bf16.mxu0 %vm2417_vm2, %v2170_v6  ;;  %v2236_v59 = vpack.c.bf16 %v2706_v54, %v2704_v53  ;;  %v527_v17 = vmul.f32 %v2704_v53, %v2704_v53 }
  0x23   :  { %2217 = vmatpush3.bf16.xpose.msk.msra.mxu1 %vm2417_vm2, %v2212_v55  ;;  %v509_v55 = vmul.f32 %v2667_v27, %v2667_v27 }
  0x24   :  { %2220 = vmatprep.subr.msk.bf16.mxu1 %vm2417_vm2, %v2218_v7  ;;  %592 = vadd.xlane.f32.xlu1 %v591_v10  ;;  %v2738_v10 = vld [vmem:[#allocation2 + $0xf8] sm:$0xff] }
  0x25   :  { %547 = vadd.xlane.f32.xlu0 %v546_v14  ;;  %v561_v62 = vsel %vm28_vm0, %v509_v55, 0.0  ;;  %v612_v14 = vsel %vm28_vm0, %v526_v5, 0.0  ;;  %v2242_v19 = vpack.c.bf16 %v2738_v10, %v2736_v9 }
  0x28   :  { %595 = vadd.xlane.f32.xlu1 %v594_v18 }
  0x29   :  { %2175 = vmatpush3.bf16.xpose.msk.msra.mxu0 %vm2417_vm2, %v2170_v6  ;;  %550 = vadd.xlane.f32.xlu0 %v549_v22  ;;  %v2731_v6 = vld [vmem:[#allocation2 + $0x70] sm:$0xff]  ;;  %v615_v22 = vsel %vm28_vm0, %v527_v17, 0.0 }
  0x2a   :  { %2178 = vmatprep.subr.msk.bf16.mxu0 %vm2417_vm2, %v2176_v20  ;;  %v513_v25 = vmul.f32 %v2731_v6, %v2731_v6 }
  0x2b   :  { %2223 = vmatpush3.bf16.xpose.msk.msra.mxu1 %vm2417_vm2, %v2218_v7  ;;  %v2733_v7 = vld [vmem:[#allocation2 + $0x78] sm:$0xff] }
  0x2c   :  { %2226 = vmatprep.subr.msk.bf16.mxu1 %vm2417_vm2, %v2224_v21  ;;  %598 = vadd.xlane.f32.xlu1 %v597_v24  ;;  %v2194_v18 = vpack.c.bf16 %v2733_v7, %v2731_v6  ;;  %v514_v39 = vmul.f32 %v2733_v7, %v2733_v7 }
  0x2d   :  { %553 = vadd.xlane.f32.xlu0 %v552_v29  ;;  %v618_v29 = vsel %vm28_vm0, %v528_v23, 0.0 }
  0x30   :  { %601 = vadd.xlane.f32.xlu1 %v600_v38  ;;  %v573_v38 = vsel %vm28_vm0, %v513_v25, 0.0 }
  0x31   :  { %2181 = vmatpush3.bf16.xpose.msk.msra.mxu0 %vm2417_vm2, %v2176_v20  ;;  %556 = vadd.xlane.f32.xlu0 %v555_v42  ;;  %v567_v20 = vsel %vm28_vm0, %v511_v11, 0.0  ;;  %v576_v42 = vsel %vm28_vm0, %v514_v39, 0.0 }
  0x32   :  { %2184 = vmatprep.subr.msk.bf16.mxu0 %vm2417_vm2, %v2182_v40 }
  0x33   :  { %2229 = vmatpush3.bf16.xpose.msk.msra.mxu1 %vm2417_vm2, %v2224_v21  ;;  %v512_v21 = vmul.f32 %v2701_v51, %v2701_v51 }
  0x34   :  { %2232 = vmatprep.subr.msk.bf16.mxu1 %vm2417_vm2, %v2230_v41  ;;  %604 = vadd.xlane.f32.xlu1 %v603_v46 }
  0x35   :  { %559 = vadd.xlane.f32.xlu0 %v558_v52  ;;  %v570_v24 = vsel %vm28_vm0, %v512_v21, 0.0 }
  0x38   :  { %607 = vadd.xlane.f32.xlu1 %v606_v56 }
  0x39   :  { %2187 = vmatpush3.bf16.xpose.msk.msra.mxu0 %vm2417_vm2, %v2182_v40  ;;  %562 = vadd.xlane.f32.xlu0 %v561_v62  ;;  %v621_v40 = vsel %vm28_vm0, %v529_v37, 0.0 }
  0x3a   :  { %2190 = vmatprep.subr.msk.bf16.mxu0 %vm2417_vm2, %v2188_v58 }
  0x3b   :  { %2235 = vmatpush3.bf16.xpose.msk.msra.mxu1 %vm2417_vm2, %v2230_v41  ;;  %v530_v41 = vmul.f32 %v2738_v10, %v2738_v10 }
  0x3c   :  { %2238 = vmatprep.subr.msk.bf16.mxu1 %vm2417_vm2, %v2236_v59  ;;  %610 = vadd.xlane.f32.xlu1 %v609_v4 }
  0x3d   :  { %565 = vadd.xlane.f32.xlu0 %v564_v8  ;;  %v624_v43 = vsel %vm28_vm0, %v530_v41, 0.0 }
  0x40   :  { %613 = vadd.xlane.f32.xlu1 %v612_v14 }
  0x41   :  { %2193 = vmatpush3.bf16.xpose.msk.msra.mxu0 %vm2417_vm2, %v2188_v58  ;;  %568 = vadd.xlane.f32.xlu0 %v567_v20 }
  0x42   :  { %2196 = vmatprep.subr.msk.bf16.mxu0 %vm2417_vm2, %v2194_v18 }
  0x43   :  { %2241 = vmatpush3.bf16.xpose.msk.msra.mxu1 %vm2417_vm2, %v2236_v59 }
  0x44   :  { %2244 = vmatprep.subr.msk.bf16.mxu1 %vm2417_vm2, %v2242_v19  ;;  %616 = vadd.xlane.f32.xlu1 %v615_v22 }
  0x45   :  { %571 = vadd.xlane.f32.xlu0 %v570_v24 }
  0x48   :  { %619 = vadd.xlane.f32.xlu1 %v618_v29 }
  0x49   :  { %2199 = vmatpush3.bf16.xpose.msk.msra.mxu0 %vm2417_vm2, %v2194_v18  ;;  %574 = vadd.xlane.f32.xlu0 %v573_v38 }
  0x4b   :  { %2247 = vmatpush3.bf16.xpose.msk.msra.mxu1 %vm2417_vm2, %v2242_v19  ;;  %vm754_vm2 = vcmask 917312  }
  0x4c   :  { %622 = vadd.xlane.f32.xlu1 %v621_v40 }
  0x4d   :  { %577 = vadd.xlane.f32.xlu0 %v576_v42 }
  0x50   :  { %1989 = vmatmul.mubr.msk.f32.vlgmr.msra.gmra.mrb[0].mxu0 %vm28_vm0, %v2520_v26  ;;  %625 = vadd.xlane.f32.xlu1 %v624_v43 }
  0x51   :  { %1991 = vmatprep.mubr.msk.f32.mxu0 %vm28_vm0, %v2531_v31 }
  0x52   :  { %2045 = vmatmul.mubr.msk.f32.vlgmr.msra.gmra.mrb[0].mxu1 %vm28_vm0, %v2529_v30 }
  0x53   :  { %2047 = vmatprep.mubr.msk.f32.mxu1 %vm28_vm0, %v2538_v35 }
  0x54   :  { %1992 = vmatmul.mubr.msk.f32.gmra.mrb[2].mxu0 %vm28_vm0, %v2536_v34  ;;  %v659_v34 = vlaneseq }
  0x55   :  { %1994 = vmatprep.mubr.msk.f32.mxu0 %vm28_vm0, %v2565_v44 }
  0x56   :  { %2048 = vmatmul.mubr.msk.f32.gmra.mrb[2].mxu1 %vm28_vm0, %v2540_v36  ;;  %v2853_v44 = vand.u32 127, %v659_v34 }
  0x57   :  { %2050 = vmatprep.mubr.msk.f32.mxu1 %vm28_vm0, %v2570_v47 }
  0x58   :  { %1995 = vmatmul.mubr.msk.f32.gmra.mrb[4].mxu0 %vm28_vm0, %v2567_v45  ;;  %v693_v57 = vadd.s32 4294967256, %v2853_v44  ;;  %v707_v19 = vadd.s32 4294967240, %v2853_v44  ;;  %v714_v29 = vadd.s32 4294967232, %v2853_v44  ;;  %v721_v43 = vadd.s32 4294967224, %v2853_v44 }
  0x59   :  { %1997 = vmatprep.mubr.msk.f32.mxu0 %vm28_vm0, %v2603_v60  ;;  %v665_v60 = vadd.s32 4294967288, %v2853_v44 }
  0x5a   :  { %2051 = vmatmul.mubr.msk.f32.gmra.mrb[4].mxu1 %vm28_vm0, %v2572_v48  ;;  %v2859_v48 = vshrl.u32 %v659_v34, 7 }
  0x5b   :  { %2053 = vmatprep.mubr.msk.f32.mxu1 %vm28_vm0, %v2608_v63 }
  0x5c   :  { %1998 = vmatmul.mubr.msk.f32.gmra.mrb[6].mxu0 %vm28_vm0, %v2605_v61  ;;  %v710_v39 = vsub.s32 %v707_v19, %v2859_v48 }
  0x5d   :  { %2000 = vmatprep.mubr.msk.f32.mxu0 %vm28_vm0, %v2635_v12  ;;  %v663_v12 = vsub.s32 %v2853_v44, %v2859_v48 }
  0x5e   :  { %2054 = vmatmul.mubr.msk.f32.gmra.mrb[6].mxu1 %vm28_vm0, %v2610_v0  ;;  %v672_v0 = vadd.s32 4294967280, %v2853_v44 }
  0x5f   :  { %2056 = vmatprep.mubr.msk.f32.mxu1 %vm28_vm0, %v2640_v15 }
  0x60   :  { %2001 = vmatmul.mubr.msk.f32.gmra.mrb[8].mxu0 %vm28_vm0, %v2637_v13  ;;  %v668_v13 = vsub.s32 %v665_v60, %v2859_v48 }
  0x61   :  { %2003 = vmatprep.mubr.msk.f32.mxu0 %vm28_vm0, %v2667_v27  ;;  %v679_v27 = vadd.s32 4294967272, %v2853_v44 }
  0x62   :  { %2057 = vmatmul.mubr.msk.f32.gmra.mrb[8].mxu1 %vm28_vm0, %v2642_v16 }
  0x63   :  { %2059 = vmatprep.mubr.msk.f32.mxu1 %vm28_vm0, %v2672_v32 }
  0x64   :  { %2004 = vmatmul.mubr.msk.f32.gmra.mrb[10].mxu0 %vm28_vm0, %v2669_v28  ;;  %v675_v28 = vsub.s32 %v672_v0, %v2859_v48  ;;  %v717_v0 = vsub.s32 %v714_v29, %v2859_v48 }
  0x65   :  { %2006 = vmatprep.mubr.msk.f32.mxu0 %vm28_vm0, %v2699_v50 }
  0x66   :  { %2060 = vmatmul.mubr.msk.f32.gmra.mrb[10].mxu1 %vm28_vm0, %v2674_v33 }
  0x67   :  { %2062 = vmatprep.mubr.msk.f32.mxu1 %vm28_vm0, %v2704_v53  ;;  %v682_v53 = vsub.s32 %v679_v27, %v2859_v48 }
  0x68   :  { %2007 = vmatmul.mubr.msk.f32.gmra.mrb[12].mxu0 %vm28_vm0, %v2701_v51  ;;  %v686_v51 = vadd.s32 4294967264, %v2853_v44 }
  0x69   :  { %2009 = vmatprep.mubr.msk.f32.mxu0 %vm28_vm0, %v2731_v6 }
  0x6a   :  { %2063 = vmatmul.mubr.msk.f32.gmra.mrb[12].mxu1 %vm28_vm0, %v2706_v54  ;;  %v689_v62 = vsub.s32 %v686_v51, %v2859_v48 }
  0x6b   :  { %2065 = vmatprep.mubr.msk.f32.mxu1 %vm28_vm0, %v2736_v9  ;;  %v696_v9 = vsub.s32 %v693_v57, %v2859_v48 }
  0x6c   :  { %2010 = vmatmul.mubr.msk.f32.gmra.mrb[14].mxu0 %vm28_vm0, %v2733_v7  ;;  %v700_v7 = vadd.s32 4294967248, %v2853_v44 }
  0x6e   :  { %2066 = vmatmul.mubr.msk.f32.gmra.mrb[14].mxu1 %vm28_vm0, %v2738_v10  ;;  %v703_v21 = vsub.s32 %v700_v7, %v2859_v48  ;;  %v742_v7 = vadd.s32 4294967200, %v2853_v44  ;;  %vm740_vm0 = vcmask 786112  }
  0x9e   :  { %v2841_v2 = vpop.xlane.xlu0 %532 }
  0x9f   :  { %v664_v32 = vrot.slane %v2841_v2, %v663_v12 }
  0xa1   :  { %v2843_v26 = vpop.xlane.xlu1 %580 }
  0xa2   :  { %v2845_v30 = vpop.xlane.xlu0 %535  ;;  %v773_v49 = vrot.slane %v2843_v26, %v663_v12 }
  0xa3   :  { %v669_v33 = vrot.slane %v2845_v30, %v668_v13 }
  0xa5   :  { %v2847_v31 = vpop.xlane.xlu1 %583  ;;  %v671_v55 = vsel %vm670_vm6, %v669_v33, %v664_v32  ;;  %v728_v32 = vadd.s32 4294967216, %v2853_v44 }
  0xa6   :  { %v2849_v35 = vpop.xlane.xlu0 %538  ;;  %v777_v50 = vrot.slane %v2847_v31, %v668_v13 }
  0xa7   :  { %v676_v54 = vrot.slane %v2849_v35, %v675_v28 }
  0xa8   :  { %v778_v59 = vsel %vm670_vm6, %v777_v50, %v773_v49  ;;  %v724_v49 = vsub.s32 %v721_v43, %v2859_v48  ;;  %vm1686_vm6 = vcmp.eq.s32.totalorder %v2859_v48, %v2853_v44 }
  0xa9   :  { %v2851_v36 = vpop.xlane.xlu1 %586  ;;  %v678_v5 = vsel %vm677_vm7, %v676_v54, %v671_v55 }
  0xaa   :  { %v2855_v45 = vpop.xlane.xlu0 %541  ;;  %v782_v56 = vrot.slane %v2851_v36, %v675_v28 }
  0xab   :  { %v683_v4 = vrot.slane %v2855_v45, %v682_v53 }
  0xac   :  { %v783_v8 = vsel %vm677_vm7, %v782_v56, %v778_v59  ;;  %v735_v56 = vadd.s32 4294967208, %v2853_v44  ;;  %v731_v59 = vsub.s32 %v728_v32, %v2859_v48  ;;  %vm1700_vm7 = vcmask 83968  }
  0xad   :  { %v2857_v47 = vpop.xlane.xlu1 %589  ;;  %v685_v17 = vsel %vm684_vm8, %v683_v4, %v678_v5 }
  0xae   :  { %v2862_v61 = vpop.xlane.xlu0 %544  ;;  %v787_v6 = vrot.slane %v2857_v47, %v682_v53 }
  0xaf   :  { %v690_v11 = vrot.slane %v2862_v61, %v689_v62 }
  0xb0   :  { %v788_v20 = vsel %vm684_vm8, %v787_v6, %v783_v8  ;;  %vm1696_vm8 = vcmask 89088  }
  0xb1   :  { %v2864_v63 = vpop.xlane.xlu1 %592  ;;  %v692_v24 = vsel %vm691_vm9, %v690_v11, %v685_v17  ;;  %v738_v11 = vsub.s32 %v735_v56, %v2859_v48 }
  0xb2   :  { %v2870_v15 = vpop.xlane.xlu0 %547  ;;  %v792_v18 = vrot.slane %v2864_v63, %v689_v62 }
  0xb3   :  { %v697_v22 = vrot.slane %v2870_v15, %v696_v9 }
  0xb4   :  { %v793_v38 = vsel %vm691_vm9, %v792_v18, %v788_v20  ;;  %v749_v20 = vadd.s32 4294967192, %v2853_v44  ;;  %vm1734_vm9 = vcmask 80912  }
  0xb5   :  { %v2872_v16 = vpop.xlane.xlu1 %595  ;;  %v699_v41 = vsel %vm698_vm10, %v697_v22, %v692_v24  ;;  %v745_v24 = vsub.s32 %v742_v7, %v2859_v48 }
  0xb6   :  { %v2878_v46 = vpop.xlane.xlu0 %550  ;;  %v797_v25 = vrot.slane %v2872_v16, %v696_v9 }
  0xb7   :  { %v704_v40 = vrot.slane %v2878_v46, %v703_v21 }
  0xb8   :  { %v798_v60 = vsel %vm698_vm10, %v797_v25, %v793_v38  ;;  %vm1771_vm10 = vcmask 37888  }
  0xb9   :  { %v2883_v52 = vpop.xlane.xlu1 %598  ;;  %v706_v27 = vsel %vm705_vm11, %v704_v40, %v699_v41  ;;  %v756_v40 = vadd.s32 4294967184, %v2853_v44 }
  0xba   :  { %v2889_v58 = vpop.xlane.xlu0 %553  ;;  %v802_v42 = vrot.slane %v2883_v52, %v703_v21 }
  0xbb   :  { %v711_v13 = vrot.slane %v2889_v58, %v710_v39 }
  0xbc   :  { %v803_v33 = vsel %vm705_vm11, %v802_v42, %v798_v60  ;;  %v752_v42 = vsub.s32 %v749_v20, %v2859_v48 }
  0xbd   :  { %v2892_v1 = vpop.xlane.xlu1 %601  ;;  %v713_v54 = vsel %vm712_vm12, %v711_v13, %v706_v27 }
  0xbe   :  { %v2898_v10 = vpop.xlane.xlu0 %556  ;;  %v807_v28 = vrot.slane %v2892_v1, %v710_v39 }
  0xbf   :  { %v718_v51 = vrot.slane %v2898_v10, %v717_v0 }
  0xc0   :  { %v808_v57 = vsel %vm712_vm12, %v807_v28, %v803_v33  ;;  %v763_v28 = vadd.s32 4294967176, %v2853_v44  ;;  %v759_v33 = vsub.s32 %v756_v40, %v2859_v48 }
  0xc1   :  { %v2901_v14 = vpop.xlane.xlu1 %604  ;;  %v720_v5 = vsel %vm719_vm13, %v718_v51, %v713_v54 }
  0xc2   :  { %v2907_v23 = vpop.xlane.xlu0 %559  ;;  %v812_v55 = vrot.slane %v2901_v14, %v717_v0  ;;  %v766_v56 = vsub.s32 %v763_v28, %v2859_v48 }
  0xc3   :  { %v725_v62 = vrot.slane %v2907_v23, %v724_v49 }
  0xc4   :  { %v813_v9 = vsel %vm719_vm13, %v812_v55, %v808_v57 }
  0xc5   :  { %v2911_v37 = vpop.xlane.xlu1 %607  ;;  %v727_v18 = vsel %vm726_vm14, %v725_v62, %v720_v5 }
  0xc6   :  { %v2917_v34 = vpop.xlane.xlu0 %562  ;;  %v817_v6 = vrot.slane %v2911_v37, %v724_v49 }
  0xc7   :  { %v732_v17 = vrot.slane %v2917_v34, %v731_v59 }
  0xc8   :  { %v818_v22 = vsel %vm726_vm14, %v817_v6, %v813_v9 }
  0xc9   :  { %v2920_v12 = vpop.xlane.xlu1 %610  ;;  %v734_v38 = vsel %vm733_vm15, %v732_v17, %v727_v18 }
  0xca   :  { %v2926_v50 = vpop.xlane.xlu0 %565  ;;  %v822_v19 = vrot.slane %v2920_v12, %v731_v59 }
  0xcb   :  { %v739_v29 = vrot.slane %v2926_v50, %v738_v11 }
  0xcc   :  { %v823_v41 = vsel %vm733_vm15, %v822_v19, %v818_v22 }
  0xcd   :  { %v2929_v53 = vpop.xlane.xlu1 %613  ;;  %v741_v0 = vsel %vm740_vm0, %v739_v29, %v734_v38 }
  0xce   :  { %v2935_v4 = vpop.xlane.xlu0 %568  ;;  %v827_v39 = vrot.slane %v2929_v53, %v738_v11 }
  0xcf   :  { %v746_v43 = vrot.slane %v2935_v4, %v745_v24 }
  0xd0   :  { %v828_v32 = vsel %vm740_vm0, %v827_v39, %v823_v41 }
  0xd1   :  { %v2939_v8 = vpop.xlane.xlu1 %616  ;;  %v748_v51 = vsel %vm747_vm1, %v746_v43, %v741_v0 }
  0xd2   :  { %v2945_v21 = vpop.xlane.xlu0 %571  ;;  %v832_v13 = vrot.slane %v2939_v8, %v745_v24 }
  0xd3   :  { %v753_v49 = vrot.slane %v2945_v21, %v752_v42 }
  0xd4   :  { %v833_v55 = vsel %vm747_vm1, %v832_v13, %v828_v32 }
  0xd5   :  { %v2948_v25 = vpop.xlane.xlu1 %619  ;;  %v755_v62 = vsel %vm754_vm2, %v753_v49, %v748_v51 }
  0xd6   :  { %v575_v60 = vpop.xlane.xlu0 %574  ;;  %v837_v54 = vrot.slane %v2948_v25, %v752_v42 }
  0xd7   :  { %v760_v57 = vrot.slane %v575_v60, %v759_v33 }
  0xd8   :  { %v838_v7 = vsel %vm754_vm2, %v837_v54, %v833_v55 }
  0xd9   :  { %v623_v27 = vpop.xlane.xlu1 %622  ;;  %v762_v11 = vsel %vm761_vm3, %v760_v57, %v755_v62 }
  0xda   :  { %v578_v59 = vpop.xlane.xlu0 %577  ;;  %v842_v5 = vrot.slane %v623_v27, %v759_v33 }
  0xdb   :  { %v767_v9 = vrot.slane %v578_v59, %v766_v56 }
  0xdc   :  { %v843_v18 = vsel %vm761_vm3, %v842_v5, %v838_v7 }
  0xdd   :  { %v626_v6 = vpop.xlane.xlu1 %625  ;;  %v769_v19 = vsel %vm768_vm4, %v767_v9, %v762_v11 }
  0xde   :  { %v847_v17 = vrot.slane %v626_v6, %v766_v56  ;;  %v2961_v22 = vadd.f32 %v769_v19, %v575_v60  ;;  %v2965_v29 = vadd.f32 %v769_v19, %v578_v59  ;;  %v870_v39 = vadd.f32 %v769_v19, %v2845_v30 }
  0xdf   :  { %v869_v40 = vadd.f32 %v769_v19, %v2841_v2  ;;  %v872_v43 = vadd.f32 %v769_v19, %v2855_v45  ;;  %v2978_v60 = vadd.f32 %v769_v19, %v2849_v35  ;;  %v2990_v30 = vadd.f32 %v769_v19, %v2862_v61 }
  0xe0   :  { %v848_v20 = vsel %vm768_vm4, %v847_v17, %v843_v18  ;;  %v3002_v45 = vadd.f32 %v769_v19, %v2878_v46  ;;  %v3014_v28 = vadd.f32 %v769_v19, %v2898_v10  ;;  %v3020_v46 = vadd.f32 %v769_v19, %v2926_v50 }
  0xe1   :  { %v2963_v24 = vadd.f32 %v848_v20, %v623_v27  ;;  %v2967_v38 = vadd.f32 %v848_v20, %v626_v6  ;;  %v886_v41 = vadd.f32 %v848_v20, %v2847_v31  ;;  %v885_v42 = vadd.f32 %v848_v20, %v2843_v26 }
  0xe2   :  { %v2975_v0 = vadd.f32 %v848_v20, %v2857_v47  ;;  %v2981_v13 = vadd.f32 %v848_v20, %v2851_v36  ;;  %v2984_v27 = vadd.f32 %v769_v19, %v2870_v15  ;;  %v2987_v2 = vadd.f32 %v848_v20, %v2872_v16 }
  0xe3   :  { %v2993_v26 = vadd.f32 %v848_v20, %v2864_v63  ;;  %v2996_v31 = vadd.f32 %v769_v19, %v2889_v58  ;;  %v2999_v35 = vadd.f32 %v848_v20, %v2892_v1  ;;  %v3005_v47 = vadd.f32 %v848_v20, %v2883_v52 }
  0xe4   :  { %v3008_v15 = vadd.f32 %v769_v19, %v2907_v23  ;;  %v3011_v61 = vadd.f32 %v848_v20, %v2911_v37  ;;  %v3017_v1 = vadd.f32 %v848_v20, %v2901_v14  ;;  %v3023_v23 = vadd.f32 %v848_v20, %v2929_v53 }
  0xe5   :  { %v3026_v37 = vadd.f32 %v769_v19, %v2917_v34  ;;  %v3029_v10 = vadd.f32 %v848_v20, %v2920_v12  ;;  %v3032_v14 = vadd.f32 %v769_v19, %v2945_v21  ;;  %v3035_v56 = vadd.f32 %v848_v20, %v2948_v25 }
  0xe6   :  { %v3038_v53 = vadd.f32 %v769_v19, %v2935_v4  ;;  %v3041_v12 = vadd.f32 %v848_v20, %v2939_v8 }
 0x123   :  { %v1990_v36 = vpop.f32.mrb[0].mxu0 }
 0x124   :  { %v902_v63 = vmul.f32 2.0, %v1990_v36  ;;  %v227_v58 = vpop.f32.mrb[1].mxu0 }
 0x125   :  { %v2046_v16 = vpop.f32.mrb[0].mxu1  ;;  %v901_v32 = vmul.f32 2.0, %v227_v58 }
 0x126   :  { %v918_v52 = vmul.f32 2.0, %v2046_v16  ;;  %v420_v33 = vpop.f32.mrb[1].mxu1  ;;  %v934_v49 = vsub.f32 %v870_v39, %v902_v63 }
 0x127   :  { %v917_v51 = vmul.f32 2.0, %v420_v33  ;;  %v933_v50 = vsub.f32 %v869_v40, %v901_v32  ;;  %v1993_v55 = vpop.f32.mrb[2].mxu0 }
 0x128   :  { %v950_v54 = vsub.f32 %v886_v41, %v918_v52  ;;  %v966_v57 = vmax.f32 %v934_v49, 0.0  ;;  %v904_v59 = vmul.f32 2.0, %v1993_v55  ;;  %v237_v5 = vpop.f32.mrb[3].mxu0 }
 0x129   :  { %v949_v34 = vsub.f32 %v885_v42, %v917_v51  ;;  %v2049_v62 = vpop.f32.mrb[2].mxu1  ;;  %v965_v21 = vmax.f32 %v933_v50, 0.0  ;;  %v903_v9 = vmul.f32 2.0, %v237_v5 }
 0x12a   :  { %v982_v6 = vmax.f32 %v950_v54, 0.0  ;;  %v920_v7 = vmul.f32 2.0, %v2049_v62  ;;  %v430_v11 = vpop.f32.mrb[3].mxu1  ;;  %v998_v17 = vmul.f32 -0.125, %v966_v57  ;;  %v936_v25 = vsub.f32 %v872_v43, %v904_v59 }
 0x12b   :  { %v981_v18 = vmax.f32 %v949_v34, 0.0  ;;  %v919_v39 = vmul.f32 2.0, %v430_v11  ;;  %v997_v4 = vmul.f32 -0.125, %v965_v21  ;;  %v935_v41 = vsub.f32 %v2978_v60, %v903_v9  ;;  %v1996_v42 = vpop.f32.mrb[4].mxu0 }
 0x12c   :  { %v1014_v40 = vmul.f32 -0.125, %v982_v6  ;;  %v952_v19 = vsub.f32 %v2975_v0, %v920_v7  ;;  %v1031_v36 = vmul.f32 1.442695, %v998_v17  ;;  %v968_v8 = vmax.f32 %v936_v25, 0.0  ;;  %v247_v58 = vpop.f32.mrb[5].mxu0  ;;  %v1381_v0 = vld [vmem:[%s3271_s0] sm:$0xff] }
 0x12d   :  { %v1013_v63 = vmul.f32 -0.125, %v981_v18  ;;  %v951_v20 = vsub.f32 %v2981_v13, %v919_v39  ;;  %v2052_v16 = vpop.f32.mrb[4].mxu1  ;;  %v1029_v32 = vmul.f32 1.442695, %v997_v4  ;;  %v967_v49 = vmax.f32 %v935_v41, 0.0  ;;  %2100 = vmatprep.mubr.f32.mxu0 %v1381_v0  ;;  %2135 = vmatprep.mubr.f32.mxu1 %v1381_v0 }
 0x12e   :  { %v1063_v52 = vmul.f32 1.442695, %v1014_v40  ;;  %v984_v33 = vmax.f32 %v952_v19, 0.0  ;;  %2322 = vpow2.f32 %v1031_v36  ;;  %v1000_v51 = vmul.f32 -0.125, %v968_v8  ;;  %v440_v50 = vpop.f32.mrb[5].mxu1 }
 0x12f   :  { %v1061_v43 = vmul.f32 1.442695, %v1013_v63  ;;  %v983_v54 = vmax.f32 %v951_v20, 0.0  ;;  %v999_v55 = vmul.f32 -0.125, %v967_v49  ;;  %v906_v57 = vmul.f32 2.0, %v1996_v42  ;;  %v1999_v13 = vpop.f32.mrb[6].mxu0 }
 0x130   :  { %2324 = vpow2.f32 %v1063_v52  ;;  %v1016_v60 = vmul.f32 -0.125, %v984_v33  ;;  %v1035_v34 = vmul.f32 1.442695, %v1000_v51  ;;  %v922_v62 = vmul.f32 2.0, %v2052_v16  ;;  %v257_v6 = vpop.f32.mrb[7].mxu0 }
 0x131   :  { %2326 = vpow2.f32 %v1029_v32  ;;  %v1015_v59 = vmul.f32 -0.125, %v983_v54  ;;  %v2055_v5 = vpop.f32.mrb[6].mxu1  ;;  %v1033_v7 = vmul.f32 1.442695, %v999_v55  ;;  %v938_v9 = vsub.f32 %v2984_v27, %v906_v57 }
 0x132   :  { %2328 = vpow2.f32 %v1061_v43  ;;  %v1067_v21 = vmul.f32 1.442695, %v1016_v60  ;;  %v450_v11 = vpop.f32.mrb[7].mxu1  ;;  %v954_v18 = vsub.f32 %v2987_v2, %v922_v62  ;;  %v905_v25 = vmul.f32 2.0, %v247_v58 }
 0x133   :  { %2330 = vpow2.f32 %v1035_v34  ;;  %v1065_v17 = vmul.f32 1.442695, %v1015_v59  ;;  %v970_v39 = vmax.f32 %v938_v9, 0.0  ;;  %v921_v40 = vmul.f32 2.0, %v440_v50  ;;  %v2002_v19 = vpop.f32.mrb[8].mxu0 }
 0x134   :  { %2332 = vpow2.f32 %v1067_v21  ;;  %v908_v4 = vmul.f32 2.0, %v1999_v13  ;;  %v986_v41 = vmax.f32 %v954_v18, 0.0  ;;  %v937_v42 = vsub.f32 %v2990_v30, %v905_v25  ;;  %v267_v8 = vpop.f32.mrb[9].mxu0 }
 0x135   :  { %2334 = vpow2.f32 %v1033_v7  ;;  %v924_v36 = vmul.f32 2.0, %v2055_v5  ;;  %v2058_v63 = vpop.f32.mrb[8].mxu1  ;;  %v1002_v27 = vmul.f32 -0.125, %v970_v39  ;;  %v953_v20 = vsub.f32 %v2993_v26, %v921_v40 }
 0x136   :  { %2336 = vpow2.f32 %v1065_v17  ;;  %v940_v16 = vsub.f32 %v2996_v31, %v908_v4  ;;  %v460_v2 = vpop.f32.mrb[9].mxu1  ;;  %v1018_v58 = vmul.f32 -0.125, %v986_v41  ;;  %v969_v52 = vmax.f32 %v937_v42, 0.0 }
 0x137   :  { %v956_v32 = vsub.f32 %v2999_v35, %v924_v36  ;;  %v907_v33 = vmul.f32 2.0, %v257_v6  ;;  %v1039_v49 = vmul.f32 1.442695, %v1002_v27  ;;  %v985_v43 = vmax.f32 %v953_v20, 0.0  ;;  %v2005_v30 = vpop.f32.mrb[10].mxu0 }
 0x138   :  { %v972_v51 = vmax.f32 %v940_v16, 0.0  ;;  %v923_v54 = vmul.f32 2.0, %v450_v11  ;;  %v3055_v50 = vpop.eup %2322  ;;  %v1071_v0 = vmul.f32 1.442695, %v1018_v58  ;;  %v1001_v60 = vmul.f32 -0.125, %v969_v52  ;;  %v277_v31 = vpop.f32.mrb[11].mxu0 }
 0x139   :  { %v988_v55 = vmax.f32 %v956_v32, 0.0  ;;  %v939_v26 = vsub.f32 %v3002_v45, %v907_v33  ;;  %v2061_v57 = vpop.f32.mrb[10].mxu1  ;;  %2338 = vpow2.f32 %v1039_v49  ;;  %v1017_v34 = vmul.f32 -0.125, %v985_v43 }
 0x13a   :  { %v3058_v13 = vpop.eup %2324  ;;  %v1004_v35 = vmul.f32 -0.125, %v972_v51  ;;  %v955_v59 = vsub.f32 %v3005_v47, %v923_v54  ;;  %v470_v62 = vpop.f32.mrb[11].mxu1  ;;  %2340 = vpow2.f32 %v1071_v0  ;;  %v1037_v6 = vmul.f32 1.442695, %v1001_v60 }
 0x13b   :  { %v3061_v5 = vpop.eup %2326  ;;  %v1020_v21 = vmul.f32 -0.125, %v988_v55  ;;  %v971_v7 = vmax.f32 %v939_v26, 0.0  ;;  %v1069_v11 = vmul.f32 1.442695, %v1017_v34  ;;  %v910_v18 = vmul.f32 2.0, %v2002_v19  ;;  %v2008_v47 = vpop.f32.mrb[12].mxu0 }
 0x13c   :  { %v3063_v9 = vpop.eup %2328  ;;  %v1043_v45 = vmul.f32 1.442695, %v1004_v35  ;;  %v987_v17 = vmax.f32 %v955_v59, 0.0  ;;  %2342 = vpow2.f32 %v1037_v6  ;;  %v926_v4 = vmul.f32 2.0, %v2058_v63  ;;  %v287_v16 = vpop.f32.mrb[13].mxu0 }
 0x13d   :  { %v3065_v25 = vpop.eup %2330  ;;  %v1075_v39 = vmul.f32 1.442695, %v1020_v21  ;;  %v1003_v40 = vmul.f32 -0.125, %v971_v7  ;;  %v2064_v41 = vpop.f32.mrb[12].mxu1  ;;  %2344 = vpow2.f32 %v1069_v11  ;;  %v942_v27 = vsub.f32 %v3008_v15, %v910_v18 }
 0x13e   :  { %v3067_v42 = vpop.eup %2332  ;;  %v1019_v36 = vmul.f32 -0.125, %v987_v17  ;;  %v909_v20 = vmul.f32 2.0, %v267_v8  ;;  %v3070_v58 = vpop.f32.mrb[13].mxu1  ;;  %2346 = vpow2.f32 %v1043_v45  ;;  %v958_v32 = vsub.f32 %v3011_v61, %v926_v4 }
 0x13f   :  { %v3072_v52 = vpop.eup %2334  ;;  %v1041_v19 = vmul.f32 1.442695, %v1003_v40  ;;  %v925_v33 = vmul.f32 2.0, %v460_v2  ;;  %2348 = vpow2.f32 %v1075_v39  ;;  %v974_v43 = vmax.f32 %v942_v27, 0.0  ;;  %v3078_v54 = vpop.f32.mrb[14].mxu0 }
 0x140   :  { %v3075_v63 = vpop.eup %2336  ;;  %v1073_v49 = vmul.f32 1.442695, %v1019_v36  ;;  %v941_v51 = vsub.f32 %v3014_v28, %v909_v20  ;;  %v990_v15 = vmax.f32 %v958_v32, 0.0  ;;  %v912_v0 = vmul.f32 2.0, %v2005_v30  ;;  %v3081_v55 = vpop.f32.mrb[15].mxu0 }
 0x141   :  { %2350 = vpow2.f32 %v1041_v19  ;;  %v957_v8 = vsub.f32 %v3017_v1, %v925_v33  ;;  %v2067_v60 = vpop.f32.mrb[14].mxu1  ;;  %v1006_v61 = vmul.f32 -0.125, %v974_v43  ;;  %v928_v26 = vmul.f32 2.0, %v2061_v57 }
 0x142   :  { %2352 = vpow2.f32 %v1073_v49  ;;  %v973_v2 = vmax.f32 %v941_v51, 0.0  ;;  %v3083_v34 = vpop.f32.mrb[15].mxu1  ;;  %v1022_v35 = vmul.f32 -0.125, %v990_v15  ;;  %v944_v28 = vsub.f32 %v3020_v46, %v912_v0 }
 0x143   :  { %v989_v59 = vmax.f32 %v957_v8, 0.0  ;;  %v911_v6 = vmul.f32 2.0, %v277_v31  ;;  %v3086_v21 = vpop.eup %2338  ;;  %v1047_v7 = vmul.f32 1.442695, %v1006_v61  ;;  %v960_v1 = vsub.f32 %v3023_v23, %v928_v26 }
 0x144   :  { %v1005_v11 = vmul.f32 -0.125, %v973_v2  ;;  %v927_v30 = vmul.f32 2.0, %v470_v62  ;;  %v3089_v45 = vpop.eup %2340  ;;  %v1079_v17 = vmul.f32 1.442695, %v1022_v35  ;;  %v976_v39 = vmax.f32 %v944_v28, 0.0 }
 0x145   :  { %v1021_v18 = vmul.f32 -0.125, %v989_v59  ;;  %v943_v57 = vsub.f32 %v3026_v37, %v911_v6  ;;  %2354 = vpow2.f32 %v1047_v7  ;;  %v992_v4 = vmax.f32 %v960_v1, 0.0 }
 0x146   :  { %v1045_v40 = vmul.f32 1.442695, %v1005_v11  ;;  %v959_v46 = vsub.f32 %v3029_v10, %v927_v30  ;;  %v3093_v31 = vpop.eup %2342  ;;  %2356 = vpow2.f32 %v1079_v17  ;;  %v1008_v27 = vmul.f32 -0.125, %v976_v39 }
 0x147   :  { %v1077_v36 = vmul.f32 1.442695, %v1021_v18  ;;  %v975_v20 = vmax.f32 %v943_v57, 0.0  ;;  %v3095_v23 = vpop.eup %2344  ;;  %v1024_v62 = vmul.f32 -0.125, %v992_v4  ;;  %v914_v32 = vmul.f32 2.0, %v2008_v47 }
 0x148   :  { %2358 = vpow2.f32 %v1045_v40  ;;  %v991_v19 = vmax.f32 %v959_v46, 0.0  ;;  %v3097_v33 = vpop.eup %2346  ;;  %v1051_v37 = vmul.f32 1.442695, %v1008_v27  ;;  %v930_v43 = vmul.f32 2.0, %v2064_v41 }
 0x149   :  { %2360 = vpow2.f32 %v1077_v36  ;;  %v1007_v49 = vmul.f32 -0.125, %v975_v20  ;;  %v3099_v51 = vpop.eup %2348  ;;  %v1083_v10 = vmul.f32 1.442695, %v1024_v62  ;;  %v946_v8 = vsub.f32 %v3032_v14, %v914_v32 }
 0x14a   :  { %v1023_v15 = vmul.f32 -0.125, %v991_v19  ;;  %v913_v0 = vmul.f32 2.0, %v287_v16  ;;  %2362 = vpow2.f32 %v1051_v37  ;;  %v962_v26 = vsub.f32 %v3035_v56, %v930_v43 }
 0x14b   :  { %v3102_v61 = vpop.eup %2350  ;;  %v1049_v2 = vmul.f32 1.442695, %v1007_v49  ;;  %v929_v47 = vmul.f32 2.0, %v3070_v58  ;;  %2364 = vpow2.f32 %v1083_v10  ;;  %v978_v41 = vmax.f32 %v946_v8, 0.0 }
 0x14c   :  { %v3106_v35 = vpop.eup %2352  ;;  %v1081_v59 = vmul.f32 1.442695, %v1023_v15  ;;  %v945_v28 = vsub.f32 %v3038_v53, %v913_v0  ;;  %v994_v6 = vmax.f32 %v962_v26, 0.0  ;;  %v916_v16 = vmul.f32 2.0, %v3078_v54 }
 0x14d   :  { %2366 = vpow2.f32 %v1049_v2  ;;  %v961_v14 = vsub.f32 %v3041_v12, %v929_v47  ;;  %v1010_v7 = vmul.f32 -0.125, %v978_v41  ;;  %v932_v1 = vmul.f32 2.0, %v2067_v60 }
 0x14e   :  { %2368 = vpow2.f32 %v1081_v59  ;;  %v977_v11 = vmax.f32 %v945_v28, 0.0  ;;  %v1026_v56 = vmul.f32 -0.125, %v994_v6  ;;  %v948_v58 = vsub.f32 %v2965_v29, %v916_v16 }
 0x14f   :  { %v993_v30 = vmax.f32 %v961_v14, 0.0  ;;  %v915_v17 = vmul.f32 2.0, %v3081_v55  ;;  %v3113_v18 = vpop.eup %2354  ;;  %v1055_v39 = vmul.f32 1.442695, %v1010_v7  ;;  %v964_v57 = vsub.f32 %v2967_v38, %v932_v1 }
 0x150   :  { %v1009_v53 = vmul.f32 -0.125, %v977_v11  ;;  %v931_v12 = vmul.f32 2.0, %v3083_v34  ;;  %v3117_v40 = vpop.eup %2356  ;;  %v1087_v54 = vmul.f32 1.442695, %v1026_v56  ;;  %v980_v46 = vmax.f32 %v948_v58, 0.0 }
 0x151   :  { %v1025_v4 = vmul.f32 -0.125, %v993_v30  ;;  %v947_v60 = vsub.f32 %v2961_v22, %v915_v17  ;;  %2370 = vpow2.f32 %v1055_v39  ;;  %v996_v55 = vmax.f32 %v964_v57, 0.0 }
 0x152   :  { %v3120_v36 = vpop.eup %2358  ;;  %v1053_v29 = vmul.f32 1.442695, %v1009_v53  ;;  %v963_v27 = vsub.f32 %v2963_v24, %v931_v12  ;;  %2372 = vpow2.f32 %v1087_v54  ;;  %v1012_v62 = vmul.f32 -0.125, %v980_v46 }
 0x153   :  { %v3123_v20 = vpop.eup %2360  ;;  %v1085_v38 = vmul.f32 1.442695, %v1025_v4  ;;  %v979_v34 = vmax.f32 %v947_v60, 0.0  ;;  %v1028_v19 = vmul.f32 -0.125, %v996_v55  ;;  %v1093_v37 = vmul.f32 %v3061_v5, %v3061_v5 }
 0x154   :  { %2374 = vpow2.f32 %v1053_v29  ;;  %v995_v32 = vmax.f32 %v963_v27, 0.0  ;;  %v3127_v22 = vpop.eup %2362  ;;  %v1059_v49 = vmul.f32 1.442695, %v1012_v62  ;;  %v1094_v24 = vmul.f32 %v3055_v50, %v3055_v50 }
 0x155   :  { %2376 = vpow2.f32 %v1085_v38  ;;  %v1011_v43 = vmul.f32 -0.125, %v979_v34  ;;  %v3131_v10 = vpop.eup %2364  ;;  %v1091_v15 = vmul.f32 1.442695, %v1028_v19  ;;  %v1125_v0 = vadd.f32 %v3061_v5, %v1093_v37 }
 0x156   :  { %v1027_v8 = vmul.f32 -0.125, %v995_v32  ;;  %v1157_v2 = vmul.f32 %v1093_v37, %v1093_v37  ;;  %2378 = vpow2.f32 %v1059_v49  ;;  %v1126_v59 = vadd.f32 %v3055_v50, %v1094_v24 }
 0x157   :  { %v3134_v26 = vpop.eup %2366  ;;  %v1057_v47 = vmul.f32 1.442695, %v1011_v43  ;;  %v1158_v41 = vmul.f32 %v1094_v24, %v1094_v24  ;;  %2380 = vpow2.f32 %v1091_v15  ;;  %v1109_v5 = vmul.f32 %v3063_v9, %v3063_v9 }
 0x158   :  { %v3137_v28 = vpop.eup %2368  ;;  %v1089_v6 = vmul.f32 1.442695, %v1027_v8  ;;  %v1189_v14 = vadd.f32 %v1157_v2, %v1125_v0  ;;  %v1221_v16 = vmul.f32 %v1157_v2, %v1157_v2  ;;  %v1110_v30 = vmul.f32 %v3058_v13, %v3058_v13 }
 0x159   :  { %2382 = vpow2.f32 %v1057_v47  ;;  %v1190_v7 = vadd.f32 %v1158_v41, %v1126_v59  ;;  %v1222_v11 = vmul.f32 %v1158_v41, %v1158_v41  ;;  %v1141_v17 = vadd.f32 %v3063_v9, %v1109_v5 }
 0x15a   :  { %2384 = vpow2.f32 %v1089_v6  ;;  %v1253_v1 = vadd.f32 %v1221_v16, %v1189_v14  ;;  %v1285_v56 = vmul.f32 %v1221_v16, %v1221_v16  ;;  %v1173_v39 = vmul.f32 %v1109_v5, %v1109_v5 }
 0x15b   :  { %v1254_v50 = vadd.f32 %v1222_v11, %v1190_v7  ;;  %v1286_v58 = vmul.f32 %v1222_v11, %v1222_v11  ;;  %v3144_v53 = vpop.eup %2370  ;;  %v1142_v12 = vadd.f32 %v3058_v13, %v1110_v30  ;;  %v1174_v54 = vmul.f32 %v1110_v30, %v1110_v30 }
 0x15c   :  { %v1317_v57 = vadd.f32 %v1285_v56, %v1253_v1  ;;  %v1095_v4 = vmul.f32 %v3072_v52, %v3072_v52  ;;  %v3149_v46 = vpop.eup %2372  ;;  %v1205_v29 = vadd.f32 %v1173_v39, %v1141_v17  ;;  %v1237_v55 = vmul.f32 %v1173_v39, %v1173_v39 }
 0x15d   :  { %v1318_v60 = vadd.f32 %v1286_v58, %v1254_v50  ;;  %v1096_v27 = vmul.f32 %v3065_v25, %v3065_v25  ;;  %v1206_v62 = vadd.f32 %v1174_v54, %v1142_v12  ;;  %v1238_v34 = vmul.f32 %v1174_v54, %v1174_v54 }
 0x15e   :  { %v3153_v38 = vpop.eup %2374  ;;  %v1349_v9 = vmul.f32 0.2, %v1317_v57  ;;  %v1127_v19 = vadd.f32 %v3072_v52, %v1095_v4  ;;  %v1269_v37 = vadd.f32 %v1237_v55, %v1205_v29  ;;  %v1301_v49 = vmul.f32 %v1237_v55, %v1237_v55 }
 0x15f   :  { %v3156_v13 = vpop.eup %2376  ;;  %v1350_v32 = vmul.f32 0.2, %v1318_v60  ;;  %v1128_v43 = vadd.f32 %v3065_v25, %v1096_v27  ;;  %v1270_v24 = vadd.f32 %v1238_v34, %v1206_v62  ;;  %v1302_v15 = vmul.f32 %v1238_v34, %v1238_v34 }
 0x160   :  { %v1159_v8 = vmul.f32 %v1095_v4, %v1095_v4  ;;  %v1160_v0 = vmul.f32 %v1096_v27, %v1096_v27  ;;  %v3159_v2 = vpop.eup %2378  ;;  %v1333_v59 = vadd.f32 %v1301_v49, %v1269_v37  ;;  %v1111_v41 = vmul.f32 %v3075_v63, %v3075_v63 }
 0x161   :  { %v2248_v47 = vpack.c.bf16 %v1350_v32, %v1349_v9  ;;  %v1112_v52 = vmul.f32 %v3067_v42, %v3067_v42  ;;  %v3165_v6 = vpop.eup %2380  ;;  %v1334_v14 = vadd.f32 %v1302_v15, %v1270_v24  ;;  %v1097_v60 = vmul.f32 %v3093_v31, %v3093_v31 }
 0x162   :  { %v1191_v16 = vadd.f32 %v1159_v8, %v1127_v19  ;;  %v1192_v7 = vadd.f32 %v1160_v0, %v1128_v43  ;;  %v1223_v25 = vmul.f32 %v1159_v8, %v1159_v8  ;;  %v1365_v5 = vmul.f32 0.2, %v1333_v59 }
 0x163   :  { %v3167_v11 = vpop.eup %2382  ;;  %2249 = vmatprep.subr.bf16.mxu0 %v2248_v47  ;;  %v1224_v1 = vmul.f32 %v1160_v0, %v1160_v0  ;;  %v1143_v56 = vadd.f32 %v3075_v63, %v1111_v41  ;;  %v1144_v30 = vadd.f32 %v3067_v42, %v1112_v52  ;;  %v1366_v58 = vmul.f32 0.2, %v1334_v14 }
 0x164   :  { %v3171_v50 = vpop.eup %2384  ;;  %2251 = vmatpush3.bf16.msra.mxu0 %v2248_v47  ;;  %v1255_v17 = vadd.f32 %v1223_v25, %v1191_v16  ;;  %v1287_v39 = vmul.f32 %v1223_v25, %v1223_v25  ;;  %v1175_v57 = vmul.f32 %v1111_v41, %v1111_v41  ;;  %v1176_v4 = vmul.f32 %v1112_v52, %v1112_v52 }
 0x165   :  { %v1256_v12 = vadd.f32 %v1224_v1, %v1192_v7  ;;  %v1288_v54 = vmul.f32 %v1224_v1, %v1224_v1  ;;  %v2280_v29 = vpack.c.bf16 %v1366_v58, %v1365_v5  ;;  %v1098_v34 = vmul.f32 %v3086_v21, %v3086_v21 }
 0x166   :  { %v1319_v55 = vadd.f32 %v1287_v39, %v1255_v17  ;;  %v1207_v27 = vadd.f32 %v1175_v57, %v1143_v56  ;;  %v1239_v9 = vmul.f32 %v1175_v57, %v1175_v57  ;;  %v1208_v62 = vadd.f32 %v1176_v4, %v1144_v30 }
 0x167   :  { %v1320_v63 = vadd.f32 %v1288_v54, %v1256_v12  ;;  %v1240_v42 = vmul.f32 %v1176_v4, %v1176_v4  ;;  %2281 = vmatprep.subr.bf16.mxu1 %v2280_v29  ;;  %v1129_v49 = vadd.f32 %v3093_v31, %v1097_v60  ;;  %v1130_v8 = vadd.f32 %v3086_v21, %v1098_v34 }
 0x168   :  { %v1351_v19 = vmul.f32 0.2, %v1319_v55  ;;  %v1271_v32 = vadd.f32 %v1239_v9, %v1207_v27  ;;  %v1303_v37 = vmul.f32 %v1239_v9, %v1239_v9  ;;  %2283 = vmatpush3.bf16.msra.mxu1 %v2280_v29  ;;  %v1161_v47 = vmul.f32 %v1097_v60, %v1097_v60 }
 0x169   :  { %v1352_v43 = vmul.f32 0.2, %v1320_v63  ;;  %v1272_v24 = vadd.f32 %v1240_v42, %v1208_v62  ;;  %v1304_v15 = vmul.f32 %v1240_v42, %v1240_v42  ;;  %v1162_v59 = vmul.f32 %v1098_v34, %v1098_v34 }
 0x16a   :  { %v1335_v0 = vadd.f32 %v1303_v37, %v1271_v32  ;;  %v1113_v41 = vmul.f32 %v3095_v23, %v3095_v23  ;;  %v1114_v16 = vmul.f32 %v3089_v45, %v3089_v45  ;;  %v1099_v31 = vmul.f32 %v3102_v61, %v3102_v61 }
 0x16b   :  { %v2252_v52 = vpack.c.bf16 %v1352_v43, %v1351_v19  ;;  %v1336_v14 = vadd.f32 %v1304_v15, %v1272_v24  ;;  %v1193_v25 = vadd.f32 %v1161_v47, %v1129_v49  ;;  %v1194_v5 = vadd.f32 %v1162_v59, %v1130_v8 }
 0x16c   :  { %v1367_v7 = vmul.f32 0.2, %v1335_v0  ;;  %v1225_v1 = vmul.f32 %v1161_v47, %v1161_v47  ;;  %v1226_v56 = vmul.f32 %v1162_v59, %v1162_v59  ;;  %v1145_v30 = vadd.f32 %v3095_v23, %v1113_v41 }
 0x16d   :  { %2253 = vmatprep.subr.bf16.mxu0 %v2252_v52  ;;  %v1368_v21 = vmul.f32 0.2, %v1336_v14  ;;  %v1146_v58 = vadd.f32 %v3089_v45, %v1114_v16  ;;  %v1177_v57 = vmul.f32 %v1113_v41, %v1113_v41  ;;  %v1178_v12 = vmul.f32 %v1114_v16, %v1114_v16 }
 0x16e   :  { %2255 = vmatpush3.bf16.msra.mxu0 %v2252_v52  ;;  %v1257_v17 = vadd.f32 %v1225_v1, %v1193_v25  ;;  %v1289_v39 = vmul.f32 %v1225_v1, %v1225_v1  ;;  %v1258_v4 = vadd.f32 %v1226_v56, %v1194_v5  ;;  %v1290_v60 = vmul.f32 %v1226_v56, %v1226_v56 }
 0x16f   :  { %v2284_v54 = vpack.c.bf16 %v1368_v21, %v1367_v7  ;;  %v1100_v29 = vmul.f32 %v3097_v33, %v3097_v33  ;;  %v1209_v27 = vadd.f32 %v1177_v57, %v1145_v30  ;;  %v1210_v9 = vadd.f32 %v1178_v12, %v1146_v58 }
 0x170   :  { %v1321_v55 = vadd.f32 %v1289_v39, %v1257_v17  ;;  %v1241_v63 = vmul.f32 %v1177_v57, %v1177_v57  ;;  %v1322_v62 = vadd.f32 %v1290_v60, %v1258_v4  ;;  %v1242_v23 = vmul.f32 %v1178_v12, %v1178_v12 }
 0x171   :  { %2285 = vmatprep.subr.bf16.mxu1 %v2284_v54  ;;  %v1131_v45 = vadd.f32 %v3102_v61, %v1099_v31  ;;  %v1132_v42 = vadd.f32 %v3097_v33, %v1100_v29  ;;  %v1163_v37 = vmul.f32 %v1099_v31, %v1099_v31  ;;  %v1164_v15 = vmul.f32 %v1100_v29, %v1100_v29 }
 0x172   :  { %2287 = vmatpush3.bf16.msra.mxu1 %v2284_v54  ;;  %v1353_v34 = vmul.f32 0.2, %v1321_v55  ;;  %v1273_v19 = vadd.f32 %v1241_v63, %v1209_v27  ;;  %v1305_v32 = vmul.f32 %v1241_v63, %v1241_v63  ;;  %v1354_v49 = vmul.f32 0.2, %v1322_v62 }
 0x173   :  { %v1274_v43 = vadd.f32 %v1242_v23, %v1210_v9  ;;  %v1306_v24 = vmul.f32 %v1242_v23, %v1242_v23  ;;  %v1195_v0 = vadd.f32 %v1163_v37, %v1131_v45  ;;  %v1227_v47 = vmul.f32 %v1163_v37, %v1163_v37 }
 0x174   :  { %v1337_v8 = vadd.f32 %v1305_v32, %v1273_v19  ;;  %v1115_v59 = vmul.f32 %v3106_v35, %v3106_v35  ;;  %v2256_v41 = vpack.c.bf16 %v1354_v49, %v1353_v34  ;;  %v1196_v61 = vadd.f32 %v1164_v15, %v1132_v42 }
 0x175   :  { %v1338_v52 = vadd.f32 %v1306_v24, %v1274_v43  ;;  %v1228_v14 = vmul.f32 %v1164_v15, %v1164_v15  ;;  %v1259_v16 = vadd.f32 %v1227_v47, %v1195_v0  ;;  %v1291_v7 = vmul.f32 %v1227_v47, %v1227_v47 }
 0x176   :  { %v1369_v33 = vmul.f32 0.2, %v1337_v8  ;;  %v1116_v31 = vmul.f32 %v3099_v51, %v3099_v51  ;;  %2257 = vmatprep.subr.bf16.mxu0 %v2256_v41  ;;  %v1147_v21 = vadd.f32 %v3106_v35, %v1115_v59  ;;  %v1179_v58 = vmul.f32 %v1115_v59, %v1115_v59 }
 0x177   :  { %v1370_v25 = vmul.f32 0.2, %v1338_v52  ;;  %v1260_v5 = vadd.f32 %v1228_v14, %v1196_v61  ;;  %v1292_v1 = vmul.f32 %v1228_v14, %v1228_v14  ;;  %2259 = vmatpush3.bf16.msra.mxu0 %v2256_v41  ;;  %v1323_v56 = vadd.f32 %v1291_v7, %v1259_v16 }
 0x178   :  { %v1148_v30 = vadd.f32 %v3099_v51, %v1116_v31  ;;  %v1180_v17 = vmul.f32 %v1116_v31, %v1116_v31  ;;  %v1101_v12 = vmul.f32 %v3120_v36, %v3120_v36  ;;  %v1102_v54 = vmul.f32 %v3113_v18, %v3113_v18 }
 0x179   :  { %v2288_v39 = vpack.c.bf16 %v1370_v25, %v1369_v33  ;;  %v1324_v57 = vadd.f32 %v1292_v1, %v1260_v5  ;;  %v1355_v4 = vmul.f32 0.2, %v1323_v56  ;;  %v1211_v60 = vadd.f32 %v1179_v58, %v1147_v21 }
 0x17a   :  { %v1212_v29 = vadd.f32 %v1180_v17, %v1148_v30  ;;  %v1243_v55 = vmul.f32 %v1179_v58, %v1179_v58  ;;  %v1244_v27 = vmul.f32 %v1180_v17, %v1180_v17  ;;  %v1133_v9 = vadd.f32 %v3120_v36, %v1101_v12 }
 0x17b   :  { %2289 = vmatprep.subr.bf16.mxu1 %v2288_v39  ;;  %v1356_v35 = vmul.f32 0.2, %v1324_v57  ;;  %v1134_v51 = vadd.f32 %v3113_v18, %v1102_v54  ;;  %v1165_v23 = vmul.f32 %v1101_v12, %v1101_v12  ;;  %v1166_v45 = vmul.f32 %v1102_v54, %v1102_v54 }
 0x17c   :  { %2291 = vmatpush3.bf16.msra.mxu1 %v2288_v39  ;;  %v1275_v63 = vadd.f32 %v1243_v55, %v1211_v60  ;;  %v1307_v62 = vmul.f32 %v1243_v55, %v1243_v55  ;;  %v1276_v34 = vadd.f32 %v1244_v27, %v1212_v29  ;;  %v1308_v19 = vmul.f32 %v1244_v27, %v1244_v27 }
 0x17d   :  { %v2260_v42 = vpack.c.bf16 %v1356_v35, %v1355_v4  ;;  %v1117_v32 = vmul.f32 %v3123_v20, %v3123_v20  ;;  %v1197_v49 = vadd.f32 %v1165_v23, %v1133_v9  ;;  %v1198_v43 = vadd.f32 %v1166_v45, %v1134_v51 }
 0x17e   :  { %v1339_v37 = vadd.f32 %v1307_v62, %v1275_v63  ;;  %v1229_v24 = vmul.f32 %v1165_v23, %v1165_v23  ;;  %v1340_v15 = vadd.f32 %v1308_v19, %v1276_v34  ;;  %v1230_v36 = vmul.f32 %v1166_v45, %v1166_v45 }
 0x17f   :  { %2261 = vmatprep.subr.bf16.mxu0 %v2260_v42  ;;  %v1118_v18 = vmul.f32 %v3117_v40, %v3117_v40  ;;  %v1149_v8 = vadd.f32 %v3123_v20, %v1117_v32  ;;  %v1181_v41 = vmul.f32 %v1117_v32, %v1117_v32  ;;  %v1103_v21 = vmul.f32 %v3134_v26, %v3134_v26 }
 0x180   :  { %v1371_v0 = vmul.f32 0.2, %v1339_v37  ;;  %2263 = vmatpush3.bf16.msra.mxu0 %v2260_v42  ;;  %v1261_v47 = vadd.f32 %v1229_v24, %v1197_v49  ;;  %v1293_v59 = vmul.f32 %v1229_v24, %v1229_v24  ;;  %v1372_v52 = vmul.f32 0.2, %v1340_v15 }
 0x181   :  { %v1262_v61 = vadd.f32 %v1230_v36, %v1198_v43  ;;  %v1294_v14 = vmul.f32 %v1230_v36, %v1230_v36  ;;  %v1150_v33 = vadd.f32 %v3117_v40, %v1118_v18  ;;  %v1182_v7 = vmul.f32 %v1118_v18, %v1118_v18 }
 0x182   :  { %v1325_v16 = vadd.f32 %v1293_v59, %v1261_v47  ;;  %v1213_v31 = vadd.f32 %v1181_v41, %v1149_v8  ;;  %v1245_v25 = vmul.f32 %v1181_v41, %v1181_v41  ;;  %v2292_v5 = vpack.c.bf16 %v1372_v52, %v1371_v0 }
 0x183   :  { %v1326_v1 = vadd.f32 %v1294_v14, %v1262_v61  ;;  %v1104_v20 = vmul.f32 %v3127_v22, %v3127_v22  ;;  %v1214_v30 = vadd.f32 %v1182_v7, %v1150_v33  ;;  %v1246_v58 = vmul.f32 %v1182_v7, %v1182_v7 }
 0x184   :  { %v1357_v56 = vmul.f32 0.2, %v1325_v16  ;;  %v1277_v17 = vadd.f32 %v1245_v25, %v1213_v31  ;;  %2293 = vmatprep.subr.bf16.mxu1 %v2292_v5  ;;  %v1309_v57 = vmul.f32 %v1245_v25, %v1245_v25  ;;  %v1135_v40 = vadd.f32 %v3134_v26, %v1103_v21 }
 0x185   :  { %v1358_v39 = vmul.f32 0.2, %v1326_v1  ;;  %v1136_v12 = vadd.f32 %v3127_v22, %v1104_v20  ;;  %2295 = vmatpush3.bf16.msra.mxu1 %v2292_v5  ;;  %v1278_v54 = vadd.f32 %v1246_v58, %v1214_v30  ;;  %v1310_v4 = vmul.f32 %v1246_v58, %v1246_v58 }
 0x186   :  { %v1167_v60 = vmul.f32 %v1103_v21, %v1103_v21  ;;  %v1168_v29 = vmul.f32 %v1104_v20, %v1104_v20  ;;  %v1341_v35 = vadd.f32 %v1309_v57, %v1277_v17  ;;  %v1119_v27 = vmul.f32 %v3137_v28, %v3137_v28 }
 0x187   :  { %v2264_v55 = vpack.c.bf16 %v1358_v39, %v1357_v56  ;;  %v1120_v9 = vmul.f32 %v3131_v10, %v3131_v10  ;;  %v1342_v51 = vadd.f32 %v1310_v4, %v1278_v54  ;;  %v1105_v15 = vmul.f32 %v3153_v38, %v3153_v38 }
 0x188   :  { %v1199_v63 = vadd.f32 %v1167_v60, %v1135_v40  ;;  %v1200_v62 = vadd.f32 %v1168_v29, %v1136_v12  ;;  %v1231_v23 = vmul.f32 %v1167_v60, %v1167_v60  ;;  %v1373_v26 = vmul.f32 0.2, %v1341_v35 }
 0x189   :  { %2265 = vmatprep.subr.bf16.mxu0 %v2264_v55  ;;  %v1232_v22 = vmul.f32 %v1168_v29, %v1168_v29  ;;  %v1151_v45 = vadd.f32 %v3137_v28, %v1119_v27  ;;  %v1152_v42 = vadd.f32 %v3131_v10, %v1120_v9  ;;  %v1374_v34 = vmul.f32 0.2, %v1342_v51 }
 0x18a   :  { %2267 = vmatpush3.bf16.msra.mxu0 %v2264_v55  ;;  %v1263_v19 = vadd.f32 %v1231_v23, %v1199_v63  ;;  %v1295_v32 = vmul.f32 %v1231_v23, %v1231_v23  ;;  %v1183_v37 = vmul.f32 %v1119_v27, %v1119_v27  ;;  %v1184_v24 = vmul.f32 %v1120_v9, %v1120_v9 }
 0x18b   :  { %v1264_v49 = vadd.f32 %v1232_v22, %v1200_v62  ;;  %v1296_v43 = vmul.f32 %v1232_v22, %v1232_v22  ;;  %v2296_v36 = vpack.c.bf16 %v1374_v34, %v1373_v26  ;;  %v1106_v10 = vmul.f32 %v3144_v53, %v3144_v53 }
 0x18c   :  { %v1327_v18 = vadd.f32 %v1295_v32, %v1263_v19  ;;  %v1215_v8 = vadd.f32 %v1183_v37, %v1151_v45  ;;  %v1247_v0 = vmul.f32 %v1183_v37, %v1183_v37  ;;  %v1216_v59 = vadd.f32 %v1184_v24, %v1152_v42 }
 0x18d   :  { %v1328_v47 = vadd.f32 %v1296_v43, %v1264_v49  ;;  %v1248_v28 = vmul.f32 %v1184_v24, %v1184_v24  ;;  %2297 = vmatprep.subr.bf16.mxu1 %v2296_v36  ;;  %v1137_v14 = vadd.f32 %v3153_v38, %v1105_v15  ;;  %v1138_v31 = vadd.f32 %v3144_v53, %v1106_v10 }
 0x18e   :  { %v1359_v41 = vmul.f32 0.2, %v1327_v18  ;;  %v1279_v52 = vadd.f32 %v1247_v0, %v1215_v8  ;;  %v1311_v61 = vmul.f32 %v1247_v0, %v1247_v0  ;;  %2299 = vmatpush3.bf16.msra.mxu1 %v2296_v36  ;;  %v1169_v5 = vmul.f32 %v1105_v15, %v1105_v15 }
 0x18f   :  { %v1360_v33 = vmul.f32 0.2, %v1328_v47  ;;  %v1280_v16 = vadd.f32 %v1248_v28, %v1216_v59  ;;  %v1312_v7 = vmul.f32 %v1248_v28, %v1248_v28  ;;  %v1170_v1 = vmul.f32 %v1106_v10, %v1106_v10 }
 0x190   :  { %v1343_v25 = vadd.f32 %v1311_v61, %v1279_v52  ;;  %v1121_v21 = vmul.f32 %v3156_v13, %v3156_v13  ;;  %v1122_v30 = vmul.f32 %v3149_v46, %v3149_v46  ;;  %v1107_v38 = vmul.f32 %v3167_v11, %v3167_v11 }
 0x191   :  { %v2268_v20 = vpack.c.bf16 %v1360_v33, %v1359_v41  ;;  %v1344_v56 = vadd.f32 %v1312_v7, %v1280_v16  ;;  %v1201_v17 = vadd.f32 %v1169_v5, %v1137_v14  ;;  %v1202_v39 = vadd.f32 %v1170_v1, %v1138_v31 }
 0x192   :  { %v1375_v58 = vmul.f32 0.2, %v1343_v25  ;;  %v1233_v57 = vmul.f32 %v1169_v5, %v1169_v5  ;;  %v1234_v40 = vmul.f32 %v1170_v1, %v1170_v1  ;;  %v1153_v12 = vadd.f32 %v3156_v13, %v1121_v21 }
 0x193   :  { %2269 = vmatprep.subr.bf16.mxu0 %v2268_v20  ;;  %v1376_v53 = vmul.f32 0.2, %v1344_v56  ;;  %v1154_v54 = vadd.f32 %v3149_v46, %v1122_v30  ;;  %v1185_v29 = vmul.f32 %v1121_v21, %v1121_v21  ;;  %v1186_v55 = vmul.f32 %v1122_v30, %v1122_v30 }
 0x194   :  { %2271 = vmatpush3.bf16.msra.mxu0 %v2268_v20  ;;  %v1265_v4 = vadd.f32 %v1233_v57, %v1201_v17  ;;  %v1297_v60 = vmul.f32 %v1233_v57, %v1233_v57  ;;  %v1266_v27 = vadd.f32 %v1234_v40, %v1202_v39  ;;  %v1298_v9 = vmul.f32 %v1234_v40, %v1234_v40  ;;  %v2386_v40 = vld [vmem:[%s3271_s0] sm:$0xff] }
 0x195   :  { %v2300_v35 = vpack.c.bf16 %v1376_v53, %v1375_v58  ;;  %v1108_v51 = vmul.f32 %v3159_v2, %v3159_v2  ;;  %v1217_v62 = vadd.f32 %v1185_v29, %v1153_v12  ;;  %v1218_v23 = vadd.f32 %v1186_v55, %v1154_v54 }
 0x196   :  { %v1329_v63 = vadd.f32 %v1297_v60, %v1265_v4  ;;  %v1249_v26 = vmul.f32 %v1185_v29, %v1185_v29  ;;  %v1330_v22 = vadd.f32 %v1298_v9, %v1266_v27  ;;  %v1250_v13 = vmul.f32 %v1186_v55, %v1186_v55 }
 0x197   :  { %2301 = vmatprep.subr.bf16.mxu1 %v2300_v35  ;;  %v1139_v46 = vadd.f32 %v3167_v11, %v1107_v38  ;;  %v1140_v45 = vadd.f32 %v3159_v2, %v1108_v51  ;;  %v1171_v32 = vmul.f32 %v1107_v38, %v1107_v38  ;;  %v1172_v24 = vmul.f32 %v1108_v51, %v1108_v51 }
 0x198   :  { %2303 = vmatpush3.bf16.msra.mxu1 %v2300_v35  ;;  %v1361_v42 = vmul.f32 0.2, %v1329_v63  ;;  %v1281_v34 = vadd.f32 %v1249_v26, %v1217_v62  ;;  %v1313_v19 = vmul.f32 %v1249_v26, %v1249_v26  ;;  %v1362_v37 = vmul.f32 0.2, %v1330_v22 }
 0x199   :  { %v1282_v49 = vadd.f32 %v1250_v13, %v1218_v23  ;;  %v1314_v43 = vmul.f32 %v1250_v13, %v1250_v13  ;;  %v1203_v36 = vadd.f32 %v1171_v32, %v1139_v46  ;;  %v1235_v18 = vmul.f32 %v1171_v32, %v1171_v32 }
 0x19a   :  { %v1345_v15 = vadd.f32 %v1313_v19, %v1281_v34  ;;  %v1123_v8 = vmul.f32 %v3171_v50, %v3171_v50  ;;  %v2272_v0 = vpack.c.bf16 %v1362_v37, %v1361_v42  ;;  %v1204_v11 = vadd.f32 %v1172_v24, %v1140_v45 }
 0x19b   :  { %v1346_v47 = vadd.f32 %v1314_v43, %v1282_v49  ;;  %v1236_v59 = vmul.f32 %v1172_v24, %v1172_v24  ;;  %v1267_v28 = vadd.f32 %v1235_v18, %v1203_v36  ;;  %v1299_v10 = vmul.f32 %v1235_v18, %v1235_v18 }
 0x19c   :  { %v1377_v2 = vmul.f32 0.2, %v1345_v15  ;;  %v1124_v41 = vmul.f32 %v3165_v6, %v3165_v6  ;;  %2273 = vmatprep.subr.bf16.mxu0 %v2272_v0  ;;  %v1155_v33 = vadd.f32 %v3171_v50, %v1123_v8  ;;  %v1187_v31 = vmul.f32 %v1123_v8, %v1123_v8  ;;  %v1382_v50 = vld [vmem:[%s3271_s0 + $0x8] sm:$0x7]  ;;  %s2388_s0 = smov 122  }
 0x19d   :  { %v1378_v52 = vmul.f32 0.2, %v1346_v47  ;;  %v1268_v61 = vadd.f32 %v1236_v59, %v1204_v11  ;;  %v1300_v14 = vmul.f32 %v1236_v59, %v1236_v59  ;;  %2275 = vmatpush3.bf16.msra.mxu0 %v2272_v0  ;;  %v1331_v16 = vadd.f32 %v1299_v10, %v1267_v28 }
 0x19e   :  { %v1156_v7 = vadd.f32 %v3165_v6, %v1124_v41  ;;  %v1188_v25 = vmul.f32 %v1124_v41, %v1124_v41  ;;  %v1219_v20 = vadd.f32 %v1187_v31, %v1155_v33  ;;  %v1251_v30 = vmul.f32 %v1187_v31, %v1187_v31 }
 0x19f   :  { %v2304_v5 = vpack.c.bf16 %v1378_v52, %v1377_v2  ;;  %v1332_v1 = vadd.f32 %v1300_v14, %v1268_v61  ;;  %v1363_v21 = vmul.f32 0.2, %v1331_v16  ;;  %v2312_v12 = vpack.c.bf16 %v1382_v50, %v2386_v40 }
 0x1a0   :  { %v1220_v56 = vadd.f32 %v1188_v25, %v1156_v7  ;;  %v1252_v58 = vmul.f32 %v1188_v25, %v1188_v25  ;;  %v1283_v17 = vadd.f32 %v1251_v30, %v1219_v20  ;;  %v1315_v39 = vmul.f32 %v1251_v30, %v1251_v30 }
 0x1a1   :  { %2305 = vmatprep.subr.bf16.mxu1 %v2304_v5  ;;  %v1364_v38 = vmul.f32 0.2, %v1332_v1  ;;  %v1685_v63 = vadd.s32 8, %v2859_v48  ;;  %v1842_v23 = vsel %vm1686_vm6, 1.0, %v2387_v3  ;;  %v1729_v18 = vadd.s32 4294967294, %v2853_v44 }
 0x1a2   :  { %2307 = vmatpush3.bf16.msra.mxu1 %v2304_v5  ;;  %v1284_v6 = vadd.f32 %v1252_v58, %v1220_v56  ;;  %v1316_v53 = vmul.f32 %v1252_v58, %v1252_v58  ;;  %v1347_v54 = vadd.f32 %v1315_v39, %v1283_v17  ;;  %v1724_v8 = vadd.s32 6, %v2853_v44 }
 0x1a3   :  { %v2276_v57 = vpack.c.bf16 %v1364_v38, %v1363_v21  ;;  %vm1687_vm5 = vcmp.eq.s32.totalorder %v1685_v63, %v2853_v44  ;;  %v1732_v47 = vsub.s32 %v1729_v18, %v2859_v48 }
 0x1a4   :  { %v1348_v4 = vadd.f32 %v1316_v53, %v1284_v6  ;;  %v1379_v60 = vmul.f32 0.2, %v1347_v54  ;;  %v1843_v62 = vsel %vm1687_vm5, 1.0, %v2387_v3  ;;  %v1727_v2 = vsub.s32 %v1724_v8, %v2859_v48 }
 0x1a5   :  { %2277 = vmatprep.subr.bf16.mxu0 %v2276_v57 }
 0x1a6   :  { %2279 = vmatpush3.bf16.msra.mxu0 %v2276_v57  ;;  %v1380_v29 = vmul.f32 0.2, %v1348_v4 }
 0x1a7   :  { %2313 = vmatprep.subr.bf16.mxu0 %v2312_v12 }
 0x1a8   :  { %v2308_v55 = vpack.c.bf16 %v1380_v29, %v1379_v60 }
 0x1a9   :  { %2101 = vmatmul.mubr.f32.vlgmr.msra.gmra.mrb[16].mxu0 %v1382_v50 }
 0x1aa   :  { %2309 = vmatprep.subr.bf16.mxu1 %v2308_v55 }
 0x1ab   :  { %2311 = vmatpush3.bf16.msra.mxu1 %v2308_v55 }
 0x1ac   :  { %2317 = vmatprep.subr.bf16.mxu1 %v2312_v12 }
 0x1ae   :  { %2136 = vmatmul.mubr.f32.vlgmr.msra.gmra.mrb[16].mxu1 %v1382_v50 }
 0x1af   :  { %2315 = vmatpush3.bf16.xpose.msra.mxu0 %v2312_v12 }
 0x1b4   :  { %2319 = vmatpush3.bf16.xpose.msra.mxu1 %v2312_v12 }
 0x27c   :  { %v2102_v35 = vpop.f32.mrb[16].mxu0 }
 0x27d   :  { %v1449_v27 = vpop.f32.mrb[17].mxu0 }
 0x27e   :  { %2142 = vmatprep.mubr.f32.mxu0 %v1449_v27 }
 0x27f   :  { %2143 = vmatmul.mubr.f32.vlgmr.msra.gmra.mrb[18].mxu0 %v2102_v35 }
 0x281   :  { %v2137_v9 = vpop.f32.mrb[16].mxu1 }
 0x282   :  { %v1524_v51 = vpop.f32.mrb[17].mxu1 }
 0x283   :  { %2149 = vmatprep.mubr.f32.mxu1 %v1524_v51 }
 0x284   :  { %2150 = vmatmul.mubr.f32.vlgmr.msra.gmra.mrb[18].mxu1 %v2137_v9 }
 0x352   :  { %v2144_v26 = vpop.f32.mrb[18].mxu0 }
 0x353   :  { %v1693_v22 = vmul.f32 %v2144_v26, %v1843_v62  ;;  %v1599_v13 = vpop.f32.mrb[19].mxu0 }
 0x354   :  { %v1692_v46 = vmul.f32 %v1842_v23, %v1599_v13  ;;  %v1718_v15 = vmul.f32 0.012345679, %v1599_v13 }
 0x355   :  { %v1701_v45 = vsel %vm1700_vm7, %v1693_v22, 0.0 }
 0x356   :  { %1702 = vadd.xlane.f32.xlu1 %v1701_v45  ;;  %v1697_v42 = vsel %vm1696_vm8, %v1692_v46, 0.0  ;;  %v1757_v36 = vmul.f32 2.0, %v1718_v15 }
 0x357   :  { %1698 = vadd.xlane.f32.xlu0 %v1697_v42  ;;  %v2151_v34 = vpop.f32.mrb[18].mxu1 }
 0x358   :  { %v1695_v19 = vmul.f32 %v2151_v34, %v1843_v62  ;;  %v1674_v32 = vpop.f32.mrb[19].mxu1 }
 0x359   :  { %v1694_v37 = vmul.f32 %v1842_v23, %v1674_v32  ;;  %v1719_v24 = vmul.f32 0.012345679, %v1674_v32 }
 0x35a   :  { %v1707_v49 = vsel %vm1700_vm7, %v1695_v19, 0.0 }
 0x35b   :  { %1708 = vadd.xlane.f32.xlu1 %v1707_v49  ;;  %v1704_v43 = vsel %vm1696_vm8, %v1694_v37, 0.0  ;;  %v1758_v3 = vmul.f32 2.0, %v1719_v24 }
 0x35c   :  { %1705 = vadd.xlane.f32.xlu0 %v1704_v43 }
 0x36c   :  { %1763 = vrot.lane.b32.xlu1 %v1758_v3, %s2388_s0 }
 0x372   :  { %1761 = vrot.lane.b32.xlu0 %v1757_v36, %s2388_s0 }
 0x3e3   :  { %v1703_v0 = vpop.xlane.xlu1 %1702 }
 0x3e4   :  { %v1846_v11 = vadd.f32 -9.0, %v1703_v0  ;;  %v1699_v59 = vpop.xlane.xlu0 %1698 }
 0x3e5   :  { %v1844_v28 = vadd.f32 -9.0, %v1699_v59 }
 0x3e6   :  { %v1716_v10 = vmul.f32 0.013888889, %v1846_v11 }
 0x3e7   :  { %v1712_v41 = vmul.f32 0.013888889, %v1844_v28 }
 0x3e8   :  { %v1733_v52 = vrot.slane %v1716_v10, %v1732_v47  ;;  %v1709_v14 = vpop.xlane.xlu1 %1708 }
 0x3e9   :  { %v1728_v61 = vrot.slane %v1712_v41, %v1727_v2  ;;  %v1847_v33 = vadd.f32 -9.0, %v1709_v14  ;;  %v1706_v16 = vpop.xlane.xlu0 %1705 }
 0x3ea   :  { %v1845_v7 = vadd.f32 -9.0, %v1706_v16 }
 0x3eb   :  { %v1735_v31 = vsel %vm1734_vm9, %v1733_v52, %v1728_v61  ;;  %v1717_v44 = vmul.f32 0.013888889, %v1847_v33 }
 0x3ec   :  { %v1755_v25 = vadd.f32 %v1735_v31, %v1712_v41  ;;  %v1713_v5 = vmul.f32 0.013888889, %v1845_v7  ;;  %v1764_v58 = vpop.permute.xlu1 %1763 }
 0x3ed   :  { %v1743_v1 = vrot.slane %v1717_v44, %v1732_v47  ;;  %v1762_v21 = vpop.permute.xlu0 %1761 }
 0x3ee   :  { %v1739_v20 = vrot.slane %v1713_v5, %v1727_v2  ;;  %v1767_v56 = vsub.f32 %v1755_v25, %v1762_v21 }
 0x3f0   :  { %v1744_v48 = vsel %vm1734_vm9, %v1743_v1, %v1739_v20  ;;  %v1769_v30 = vmul.f32 0.1, %v1767_v56 }
 0x3f1   :  { %v1756_v38 = vadd.f32 %v1744_v48, %v1713_v5 }
 0x3f2   :  { %1772 = vst.msk [vmem:[%s3272_s3] sm:$0x3f] %vm1771_vm10, %v1769_v30 }
 0x3f3   :  { %v1768_v17 = vsub.f32 %v1756_v38, %v1764_v58 }
 0x3f5   :  { %v1770_v39 = vmul.f32 0.1, %v1768_v17 }
 0x3f7   :  { %1773 = vst.msk [vmem:[%s3272_s3 + $0x8] sm:$0x3f] %vm1771_vm10, %v1770_v39 }

</bundles_post_ra>
